<compile_context>
chip_gen: v7x
topology: tpu7x:2x2x1
jax: 0.10.0
libtpu: 0.0.40
codegen_flags: <defaults>
</compile_context>

<pallas_src>
import functools

import jax
import jax.numpy as jnp
from jax.experimental import pallas as pl
from jax.experimental.pallas import tpu as pltpu


# ----------------------------- Pallas kernels -------------------------------

def _matmul_bias_kernel(a_ref, w_ref, b_ref, o_ref, acc_ref, *, leaky):
    """Tiled im2col-conv GEMM: bf16 x bf16 -> f32 acc; bias folded into init."""
    kk = pl.program_id(2)
    n_k = pl.num_programs(2)

    @pl.when(kk == 0)
    def _():
        acc_ref[...] = jnp.broadcast_to(b_ref[...], acc_ref.shape)

    acc_ref[...] += jnp.dot(a_ref[...], w_ref[...],
                            preferred_element_type=jnp.float32)

    @pl.when(kk == n_k - 1)
    def _():
        y = acc_ref[...]
        if leaky:
            y = jnp.where(y >= 0.0, y, 0.2 * y)
        o_ref[...] = y.astype(o_ref.dtype)


def _matmul_bias_stats_kernel(a_ref, w_ref, b_ref, o_ref, sum_ref, ssq_ref,
                              acc_ref, *, m_true, tm, needs_mask):
    """Conv GEMM + per-channel (sum, sum-of-squares) partials for BatchNorm.

    NOTE: all pl.program_id reads happen at kernel top level (closed over by
    the pl.when bodies) — calling program_id inside a pl.when branch fails to
    lower (the branch jaxpr is outside the Pallas grid scope).
    """
    kk = pl.program_id(2)
    n_k = pl.num_programs(2)
    if needs_mask:
        mi = pl.program_id(0)
        row = mi * tm + jax.lax.broadcasted_iota(jnp.int32, (tm, 1), 0)

    @pl.when(kk == 0)
    def _():
        acc_ref[...] = jnp.broadcast_to(b_ref[...], acc_ref.shape)

    acc_ref[...] += jnp.dot(a_ref[...], w_ref[...],
                            preferred_element_type=jnp.float32)

    @pl.when(kk == n_k - 1)
    def _():
        y = acc_ref[...]
        o_ref[...] = y.astype(o_ref.dtype)
        # Padded M rows carry the bias (from the acc init); mask them out of
        # the batch statistics.
        ym = jnp.where(row < m_true, y, 0.0) if needs_mask else y
        sum_ref[0] = jnp.sum(ym, axis=0, keepdims=True)
        ssq_ref[0] = jnp.sum(ym * ym, axis=0, keepdims=True)


def _scale_shift_leaky_kernel(x_ref, scale_ref, shift_ref, o_ref):
    """y = leaky_relu(x * scale + shift, 0.2); scale/shift are (1, Cp) rows."""
    y = x_ref[...].astype(jnp.float32) * scale_ref[...] + shift_ref[...]
    o_ref[...] = jnp.where(y >= 0.0, y, 0.2 * y).astype(o_ref.dtype)


# ----------------------------- tiling helpers --------------------------------

_TM_ELEM = 1024       # max rows per elementwise (BN apply) tile


def _round_up(x, m):
    return ((x + m - 1) // m) * m


def _vmem_limit_bytes():
    # Per-generation scoped-VMEM budget: ~3/4 of physical VMEM (≈48 MiB on
    # v7x, ≈96 MiB on v5e/v6e).  Conservative fallback off-TPU / interpret.
    try:
        phys = pltpu.get_tpu_info().vmem_capacity_bytes
        return int(min(phys * 3 // 4, 100 * 1024 * 1024))
    except Exception:
        return 64 * 1024 * 1024


_VMEM_LIMIT = _vmem_limit_bytes()


def _pick_reduce_tile(k):
    # K tile: full dim if small / awkward, else a 128-aligned divisor.
    if k <= 1024:
        return k
    for t in (1024, 512, 256, 128):
        if k % t == 0:
            return t
    return k


def _pick_lane_tile(cp):
    # cp is always a multiple of 128 (lane-dense padded channel count).
    if cp <= 256:
        return cp
    for t in (256, 128):
        if cp % t == 0:
            return t
    return cp


def _pick_elem_tile(mp):
    if mp <= _TM_ELEM:
        return mp
    t = _TM_ELEM
    while t >= 8:
        if mp % t == 0:
            return t
        t //= 2
    return mp


# ----------------------------- glue (im2col) ---------------------------------

def _im2col(x_nhwc, kh, kw, stride, pad):
    # TODO(synk): stride-2 window gather is not expressible as a BlockSpec
    # index_map; slab is materialized by XLA (kept in bf16 to halve traffic).
    n, h, w, c = x_nhwc.shape
    xp = jnp.pad(x_nhwc, ((0, 0), (pad, pad), (pad, pad), (0, 0)))
    ho = (h + 2 * pad - kh) // stride + 1
    wo = (w + 2 * pad - kw) // stride + 1
    cols = []
    for i in range(kh):
        for j in range(kw):
            cols.append(xp[:, i:i + stride * ho:stride,
                           j:j + stride * wo:stride, :])
    patches = jnp.stack(cols, axis=3)                  # (N, Ho, Wo, KH*KW, C)
    return patches.reshape(n * ho * wo, kh * kw * c), ho, wo


# ----------------------------- pallas_call wrappers --------------------------

def _conv_mm(x_nhwc, weight, bias, k, stride, pad, *, leaky, with_stats,
             out_dtype=jnp.bfloat16):
    """Conv2d via im2col + tiled Pallas matmul.

    Returns (out_padded (Mp, Cp), stats-or-None, (m, ho, wo, c_out, cp, n)).
    C_out is zero-padded to a multiple of 128 so MXU output / HBM stores are
    lane-dense; pad columns (and pad rows) are sliced off by the caller.
    """
    n = x_nhwc.shape[0]
    c_out = weight.shape[0]
    cp = _round_up(c_out, 128)

    x_bf = x_nhwc if x_nhwc.dtype == jnp.bfloat16 else x_nhwc.astype(jnp.bfloat16)
    a, ho, wo = _im2col(x_bf, k, k, stride, pad)       # (M, K) bf16
    m, kdim = a.shape

    w_mat = jnp.transpose(weight, (2, 3, 1, 0)).reshape(kdim, c_out)
    w_mat = jnp.pad(w_mat, ((0, 0), (0, cp - c_out))).astype(jnp.bfloat16)
    b_row = jnp.pad(bias, (0, cp - c_out)).reshape(1, cp).astype(jnp.float32)

    tm_cap = 2048 if c_out <= 32 else 1024
    tm = min(tm_cap, _round_up(m, 8))
    mp = _round_up(m, tm)
    if mp != m:
        a = jnp.pad(a, ((0, mp - m), (0, 0)))
    tk = _pick_reduce_tile(kdim)
    tn = _pick_lane_tile(cp)
    # Keep >= 2 blocks across the "parallel" axes so v7x's 2nd TC gets work.
    if mp // tm == 1 and cp // tn == 1 and mp >= 16 and (mp // 2) % 8 == 0:
        tm = mp // 2
    grid = (mp // tm, cp // tn, kdim // tk)

    in_specs = [
        pl.BlockSpec((tm, tk), lambda i, j, l: (i, l)),
        pl.BlockSpec((tk, tn), lambda i, j, l: (l, j)),
        pl.BlockSpec((1, tn), lambda i, j, l: (0, j)),
    ]
    cparams = pltpu.CompilerParams(
        dimension_semantics=("parallel", "parallel", "arbitrary"),
        vmem_limit_bytes=_VMEM_LIMIT,
    )
    scratch = [pltpu.VMEM((tm, tn), jnp.float32)]
    meta = (m, ho, wo, c_out, cp, n)

    if with_stats:
        kernel = functools.partial(_matmul_bias_stats_kernel,
                                   m_true=m, tm=tm, needs_mask=(mp != m))
        out_p, sums, ssqs = pl.pallas_call(
            kernel,
            out_shape=(jax.ShapeDtypeStruct((mp, cp), out_dtype),
                       jax.ShapeDtypeStruct((grid[0], 1, cp), jnp.float32),
                       jax.ShapeDtypeStruct((grid[0], 1, cp), jnp.float32)),
            grid=grid,
            in_specs=in_specs,
            out_specs=(pl.BlockSpec((tm, tn), lambda i, j, l: (i, j)),
                       pl.BlockSpec((1, 1, tn), lambda i, j, l: (i, 0, j)),
                       pl.BlockSpec((1, 1, tn), lambda i, j, l: (i, 0, j))),
            scratch_shapes=scratch,
            compiler_params=cparams,
        )(a, w_mat, b_row)
        return out_p, (sums, ssqs), meta

    kernel = functools.partial(_matmul_bias_kernel, leaky=leaky)
    out_p = pl.pallas_call(
        kernel,
        out_shape=jax.ShapeDtypeStruct((mp, cp), out_dtype),
        grid=grid,
        in_specs=in_specs,
        out_specs=pl.BlockSpec((tm, tn), lambda i, j, l: (i, j)),
        scratch_shapes=scratch,
        compiler_params=cparams,
    )(a, w_mat, b_row)
    return out_p, None, meta


def _bn_leaky_apply(x_p, scale_row, shift_row):
    mp, cp = x_p.shape                      # cp is a multiple of 128
    tm = _pick_elem_tile(mp)
    return pl.pallas_call(
        _scale_shift_leaky_kernel,
        out_shape=jax.ShapeDtypeStruct((mp, cp), jnp.bfloat16),
        grid=(mp // tm,),
        in_specs=[
            pl.BlockSpec((tm, cp), lambda i: (i, 0)),
            pl.BlockSpec((1, cp), lambda i: (0, 0)),
            pl.BlockSpec((1, cp), lambda i: (0, 0)),
        ],
        out_specs=pl.BlockSpec((tm, cp), lambda i: (i, 0)),
        compiler_params=pltpu.CompilerParams(
            dimension_semantics=("parallel",),
            vmem_limit_bytes=_VMEM_LIMIT),
    )(x_p, scale_row, shift_row)


# ----------------------------- layers -----------------------------------------

def _conv2d(x_nhwc, weight, bias, k, stride, pad, *, leaky,
            out_dtype=jnp.bfloat16):
    out_p, _, (m, ho, wo, c_out, _cp, n) = _conv_mm(
        x_nhwc, weight, bias, k, stride, pad, leaky=leaky, with_stats=False,
        out_dtype=out_dtype)
    return out_p[:m, :c_out].reshape(n, ho, wo, c_out)


def _conv_bn_leaky(x_nhwc, weight, bias, gamma, beta, k, stride, pad, eps):
    # Conv (with fused batch-stat partials) -> BN(train stats) + LeakyReLU(0.2).
    out_p, (sums, ssqs), (m, ho, wo, c_out, cp, n) = _conv_mm(
        x_nhwc, weight, bias, k, stride, pad, leaky=False, with_stats=True)
    s = jnp.sum(sums, axis=(0, 1))[:c_out]
    ss = jnp.sum(ssqs, axis=(0, 1))[:c_out]
    mean = s / m
    var = jnp.maximum(ss / m - mean * mean, 0.0)       # biased var (train mode)
    scale = gamma * jax.lax.rsqrt(var + eps)
    shift = beta - mean * scale
    scale_row = jnp.pad(scale, (0, cp - c_out)).reshape(1, cp).astype(jnp.float32)
    shift_row = jnp.pad(shift, (0, cp - c_out)).reshape(1, cp).astype(jnp.float32)
    y_p = _bn_leaky_apply(out_p, scale_row, shift_row)
    return y_p[:m, :c_out].reshape(n, ho, wo, c_out)


# ----------------------------- DISBlock forward ------------------------------

def init_disblock_params(key, i_dim, n_dim, n_down):
    params = {}
    k = key

    def nrm(kk, shape, s=0.05):
        return s * jax.random.normal(kk, shape, dtype=jnp.float32)

    k, sub = jax.random.split(k)
    params["head_w"] = nrm(sub, (n_dim, i_dim, 4, 4))
    k, sub = jax.random.split(k)
    params["head_b"] = nrm(sub, (n_dim,))
    for i in range(n_down):
        cin, cout = n_dim * 2 ** i, n_dim * 2 ** (i + 1)
        k, sub = jax.random.split(k)
        params[f"body{i}_w"] = nrm(sub, (cout, cin, 4, 4))
        k, sub = jax.random.split(k)
        params[f"body{i}_b"] = nrm(sub, (cout,))
        params[f"body{i}_gamma"] = jnp.ones((cout,), jnp.float32)
        params[f"body{i}_beta"] = jnp.zeros((cout,), jnp.float32)
    cin = n_dim * 2 ** n_down
    k, sub = jax.random.split(k)
    params["term_w"] = nrm(sub, (1, cin, 3, 3))
    k, sub = jax.random.split(k)
    params["term_b"] = nrm(sub, (1,))
    return params


def disblock_forward(x_nchw, params, n_down):
    x = jnp.transpose(x_nchw, (0, 2, 3, 1)).astype(jnp.float32)   # NCHW -> NHWC
    # head: Conv2d(k=4, s=2, p=1) + LeakyReLU(0.2) fused in the GEMM epilogue.
    x = _conv2d(x, params["head_w"], params["head_b"], 4, 2, 1, leaky=True)
    # body: [Conv2d(4,2,1) -> BatchNorm2d(eps=0.8, batch stats) -> LeakyReLU(0.2)]
    for i in range(n_down):
        x = _conv_bn_leaky(x, params[f"body{i}_w"], params[f"body{i}_b"],
                           params[f"body{i}_gamma"], params[f"body{i}_beta"],
                           4, 2, 1, eps=0.8)
    # term: Conv2d(k=3, s=1, p=1) -> 1 channel, f32 output.
    x = _conv2d(x, params["term_w"], params["term_b"], 3, 1, 1, leaky=False,
                out_dtype=jnp.float32)
    return jnp.transpose(x, (0, 3, 1, 2))                          # NHWC -> NCHW


if __name__ == "__main__":
    i_dim, n_dim, n_down = 4, 8, 1
    key = jax.random.PRNGKey(0)
    key, xkey = jax.random.split(key)
    x = jax.random.normal(xkey, (2, i_dim, 16, 16), dtype=jnp.float32)  # NCHW
    params = init_disblock_params(key, i_dim, n_dim, n_down)

    out = jax.jit(functools.partial(disblock_forward, n_down=n_down))(x, params)
    out = jax.block_until_ready(out)

    expected = (2, 1, 16 // (2 ** (1 + n_down)), 16 // (2 ** (1 + n_down)))
    assert out.shape == expected, (out.shape, expected)
    assert bool(jnp.all(jnp.isfinite(out)))
    print("KERNEL_OK")
</pallas_src>

<mosaic_0001>
module attributes {stable_mosaic.version = 11 : i64} {
  func.func @_matmul_bias_kernel(%arg0: i32, %arg1: i32, %arg2: i32, %arg3: memref<64x64xbf16, #tpu.memory_space<vmem>>, %arg4: memref<64x128xbf16, #tpu.memory_space<vmem>>, %arg5: memref<1x128xf32, #tpu.memory_space<vmem>>, %arg6: memref<64x128xbf16, #tpu.memory_space<vmem>>, %arg7: memref<64x128xf32, #tpu.memory_space<vmem>>) attributes {dimension_semantics = [#tpu.dimension_semantics<parallel>, #tpu.dimension_semantics<parallel>, #tpu.dimension_semantics<arbitrary>], iteration_bounds = array<i64: 2, 1, 1>, scalar_prefetch = 0 : i64, scratch_operands = 1 : i64, tpu.core_type = #tpu.core_type<tc>, window_params = [{transform_indices = @transform_0, window_bounds = array<i64: 64, 64>}, {transform_indices = @transform_1, window_bounds = array<i64: 64, 128>}, {transform_indices = @transform_2, window_bounds = array<i64: 1, 128>}, {transform_indices = @transform_3, window_bounds = array<i64: 64, 128>}]} {
    %c0_i32 = arith.constant 0 : i32
    %0 = arith.cmpi eq, %arg2, %c0_i32 : i32
    %1 = arith.extui %0 : i1 to i32
    %c0_i32_0 = arith.constant 0 : i32
    %2 = arith.cmpi ne, %1, %c0_i32_0 : i32
    scf.if %2 {
      %c0_10 = arith.constant 0 : index
      %c0_11 = arith.constant 0 : index
      %12 = vector.load %arg5[%c0_10, %c0_11] : memref<1x128xf32, #tpu.memory_space<vmem>>, vector<1x128xf32>
      %13 = vector.shape_cast %12 : vector<1x128xf32> to vector<1x128xf32>
      %14 = vector.broadcast %13 : vector<1x128xf32> to vector<64x128xf32>
      %c0_12 = arith.constant 0 : index
      %c0_13 = arith.constant 0 : index
      %15 = vector.load %arg7[%c0_12, %c0_13] : memref<64x128xf32, #tpu.memory_space<vmem>>, vector<64x128xf32>
      tpu.vector_store %arg7[%c0_12, %c0_13], %14 {strides = array<i32>} : memref<64x128xf32, #tpu.memory_space<vmem>>, vector<64x128xf32>,
    } else {
    }
    %c0 = arith.constant 0 : index
    %c0_1 = arith.constant 0 : index
    %3 = vector.load %arg7[%c0, %c0_1] : memref<64x128xf32, #tpu.memory_space<vmem>>, vector<64x128xf32>
    %c0_2 = arith.constant 0 : index
    %c0_3 = arith.constant 0 : index
    %4 = vector.load %arg3[%c0_2, %c0_3] : memref<64x64xbf16, #tpu.memory_space<vmem>>, vector<64x64xbf16>
    %c0_4 = arith.constant 0 : index
    %c0_5 = arith.constant 0 : index
    %5 = vector.load %arg4[%c0_4, %c0_5] : memref<64x128xbf16, #tpu.memory_space<vmem>>, vector<64x128xbf16>
    %cst = arith.constant dense<0.000000e+00> : vector<64x128xf32>
    %6 = tpu.matmul %4, %5, %cst {dimension_numbers = #tpu.dot_dimension_numbers<[1], [0], [0], [1], [0, 0, 1, 1], [], []>} : vector<64x64xbf16>, vector<64x128xbf16>, vector<64x128xf32> -> vector<64x128xf32>
    %7 = arith.addf %3, %6 : vector<64x128xf32>
    %c0_6 = arith.constant 0 : index
    %c0_7 = arith.constant 0 : index
    %8 = vector.load %arg7[%c0_6, %c0_7] : memref<64x128xf32, #tpu.memory_space<vmem>>, vector<64x128xf32>
    tpu.vector_store %arg7[%c0_6, %c0_7], %7 {strides = array<i32>} : memref<64x128xf32, #tpu.memory_space<vmem>>, vector<64x128xf32>,
    %c0_i32_8 = arith.constant 0 : i32
    %9 = arith.cmpi eq, %arg2, %c0_i32_8 : i32
    %10 = arith.extui %9 : i1 to i32
    %c0_i32_9 = arith.constant 0 : i32
    %11 = arith.cmpi ne, %10, %c0_i32_9 : i32
    scf.if %11 {
      %c0_10 = arith.constant 0 : index
      %c0_11 = arith.constant 0 : index
      %12 = vector.load %arg7[%c0_10, %c0_11] : memref<64x128xf32, #tpu.memory_space<vmem>>, vector<64x128xf32>
      %cst_12 = arith.constant 0.000000e+00 : f32
      %13 = vector.broadcast %cst_12 : f32 to vector<64x128xf32>
      %14 = arith.cmpf oge, %12, %13 : vector<64x128xf32>
      %cst_13 = arith.constant 2.000000e-01 : f32
      %15 = vector.broadcast %cst_13 : f32 to vector<64x128xf32>
      %16 = arith.mulf %15, %12 : vector<64x128xf32>
      %17 = arith.select %14, %12, %16 : vector<64x128xi1>, vector<64x128xf32>
      %18 = arith.truncf %17 : vector<64x128xf32> to vector<64x128xbf16>
      %c0_14 = arith.constant 0 : index
      %c0_15 = arith.constant 0 : index
      %19 = vector.load %arg6[%c0_14, %c0_15] : memref<64x128xbf16, #tpu.memory_space<vmem>>, vector<64x128xbf16>
      tpu.vector_store %arg6[%c0_14, %c0_15], %18 {strides = array<i32>} : memref<64x128xbf16, #tpu.memory_space<vmem>>, vector<64x128xbf16>,
    } else {
    }
    return
  }
  func.func @transform_0(%arg0: i32, %arg1: i32, %arg2: i32) -> (i32, i32) {
    %c0_i32 = arith.constant 0 : i32
    return %arg0, %arg2 : i32, i32
  }
  func.func @transform_1(%arg0: i32, %arg1: i32, %arg2: i32) -> (i32, i32) {
    %c0_i32 = arith.constant 0 : i32
    return %arg2, %arg1 : i32, i32
  }
  func.func @transform_2(%arg0: i32, %arg1: i32, %arg2: i32) -> (i32, i32) {
    %c0_i32 = arith.constant 0 : i32
    %c0_i32_0 = arith.constant 0 : i32
    return %c0_i32, %arg1 : i32, i32
  }
  func.func @transform_3(%arg0: i32, %arg1: i32, %arg2: i32) -> (i32, i32) {
    %c0_i32 = arith.constant 0 : i32
    return %arg0, %arg1 : i32, i32
  }
}

module attributes {stable_mosaic.version = 11 : i64} {
  func.func @_matmul_bias_stats_kernel(%arg0: i32, %arg1: i32, %arg2: i32, %arg3: memref<16x128xbf16, #tpu.memory_space<vmem>>, %arg4: memref<128x128xbf16, #tpu.memory_space<vmem>>, %arg5: memref<1x128xf32, #tpu.memory_space<vmem>>, %arg6: memref<16x128xbf16, #tpu.memory_space<vmem>>, %arg7: memref<1x1x128xf32, #tpu.memory_space<vmem>>, %arg8: memref<1x1x128xf32, #tpu.memory_space<vmem>>, %arg9: memref<16x128xf32, #tpu.memory_space<vmem>>) attributes {dimension_semantics = [#tpu.dimension_semantics<parallel>, #tpu.dimension_semantics<parallel>, #tpu.dimension_semantics<arbitrary>], iteration_bounds = array<i64: 2, 1, 1>, scalar_prefetch = 0 : i64, scratch_operands = 1 : i64, tpu.core_type = #tpu.core_type<tc>, window_params = [{transform_indices = @transform_0, window_bounds = array<i64: 16, 128>}, {transform_indices = @transform_1, window_bounds = array<i64: 128, 128>}, {transform_indices = @transform_2, window_bounds = array<i64: 1, 128>}, {transform_indices = @transform_3, window_bounds = array<i64: 16, 128>}, {transform_indices = @transform_4, window_bounds = array<i64: 1, 1, 128>}, {transform_indices = @transform_5, window_bounds = array<i64: 1, 1, 128>}]} {
    %c0_i32 = arith.constant 0 : i32
    %0 = arith.cmpi eq, %arg2, %c0_i32 : i32
    %1 = arith.extui %0 : i1 to i32
    %c0_i32_0 = arith.constant 0 : i32
    %2 = arith.cmpi ne, %1, %c0_i32_0 : i32
    scf.if %2 {
      %c0_10 = arith.constant 0 : index
      %c0_11 = arith.constant 0 : index
      %12 = vector.load %arg5[%c0_10, %c0_11] : memref<1x128xf32, #tpu.memory_space<vmem>>, vector<1x128xf32>
      %13 = vector.shape_cast %12 : vector<1x128xf32> to vector<1x128xf32>
      %14 = vector.broadcast %13 : vector<1x128xf32> to vector<16x128xf32>
      %c0_12 = arith.constant 0 : index
      %c0_13 = arith.constant 0 : index
      %15 = vector.load %arg9[%c0_12, %c0_13] : memref<16x128xf32, #tpu.memory_space<vmem>>, vector<16x128xf32>
      tpu.vector_store %arg9[%c0_12, %c0_13], %14 {strides = array<i32>} : memref<16x128xf32, #tpu.memory_space<vmem>>, vector<16x128xf32>,
    } else {
    }
    %c0 = arith.constant 0 : index
    %c0_1 = arith.constant 0 : index
    %3 = vector.load %arg9[%c0, %c0_1] : memref<16x128xf32, #tpu.memory_space<vmem>>, vector<16x128xf32>
    %c0_2 = arith.constant 0 : index
    %c0_3 = arith.constant 0 : index
    %4 = vector.load %arg3[%c0_2, %c0_3] : memref<16x128xbf16, #tpu.memory_space<vmem>>, vector<16x128xbf16>
    %c0_4 = arith.constant 0 : index
    %c0_5 = arith.constant 0 : index
    %5 = vector.load %arg4[%c0_4, %c0_5] : memref<128x128xbf16, #tpu.memory_space<vmem>>, vector<128x128xbf16>
    %cst = arith.constant dense<0.000000e+00> : vector<16x128xf32>
    %6 = tpu.matmul %4, %5, %cst {dimension_numbers = #tpu.dot_dimension_numbers<[1], [0], [0], [1], [0, 0, 1, 1], [], []>} : vector<16x128xbf16>, vector<128x128xbf16>, vector<16x128xf32> -> vector<16x128xf32>
    %7 = arith.addf %3, %6 : vector<16x128xf32>
    %c0_6 = arith.constant 0 : index
    %c0_7 = arith.constant 0 : index
    %8 = vector.load %arg9[%c0_6, %c0_7] : memref<16x128xf32, #tpu.memory_space<vmem>>, vector<16x128xf32>
    tpu.vector_store %arg9[%c0_6, %c0_7], %7 {strides = array<i32>} : memref<16x128xf32, #tpu.memory_space<vmem>>, vector<16x128xf32>,
    %c0_i32_8 = arith.constant 0 : i32
    %9 = arith.cmpi eq, %arg2, %c0_i32_8 : i32
    %10 = arith.extui %9 : i1 to i32
    %c0_i32_9 = arith.constant 0 : i32
    %11 = arith.cmpi ne, %10, %c0_i32_9 : i32
    scf.if %11 {
      %c0_10 = arith.constant 0 : index
      %c0_11 = arith.constant 0 : index
      %12 = vector.load %arg9[%c0_10, %c0_11] : memref<16x128xf32, #tpu.memory_space<vmem>>, vector<16x128xf32>
      %13 = arith.truncf %12 : vector<16x128xf32> to vector<16x128xbf16>
      %c0_12 = arith.constant 0 : index
      %c0_13 = arith.constant 0 : index
      %14 = vector.load %arg6[%c0_12, %c0_13] : memref<16x128xbf16, #tpu.memory_space<vmem>>, vector<16x128xbf16>
      tpu.vector_store %arg6[%c0_12, %c0_13], %13 {strides = array<i32>} : memref<16x128xbf16, #tpu.memory_space<vmem>>, vector<16x128xbf16>,
      %cst_14 = arith.constant dense<0.000000e+00> : vector<128xf32>
      %15 = vector.multi_reduction <add>, %12, %cst_14 [0] : vector<16x128xf32> to vector<128xf32>
      %16 = vector.shape_cast %15 : vector<128xf32> to vector<1x128xf32>
      %c0_15 = arith.constant 0 : index
      %c0_16 = arith.constant 0 : index
      %c0_17 = arith.constant 0 : index
      %17 = vector.load %arg7[%c0_15, %c0_16, %c0_17] : memref<1x1x128xf32, #tpu.memory_space<vmem>>, vector<1x1x128xf32>
      %18 = vector.shape_cast %17 : vector<1x1x128xf32> to vector<1x128xf32>
      %19 = vector.shape_cast %16 : vector<1x128xf32> to vector<1x1x128xf32>
      tpu.vector_store %arg7[%c0_15, %c0_16, %c0_17], %19 {strides = array<i32>} : memref<1x1x128xf32, #tpu.memory_space<vmem>>, vector<1x1x128xf32>,
      %20 = arith.mulf %12, %12 : vector<16x128xf32>
      %cst_18 = arith.constant dense<0.000000e+00> : vector<128xf32>
      %21 = vector.multi_reduction <add>, %20, %cst_18 [0] : vector<16x128xf32> to vector<128xf32>
      %22 = vector.shape_cast %21 : vector<128xf32> to vector<1x128xf32>
      %c0_19 = arith.constant 0 : index
      %c0_20 = arith.constant 0 : index
      %c0_21 = arith.constant 0 : index
      %23 = vector.load %arg8[%c0_19, %c0_20, %c0_21] : memref<1x1x128xf32, #tpu.memory_space<vmem>>, vector<1x1x128xf32>
      %24 = vector.shape_cast %23 : vector<1x1x128xf32> to vector<1x128xf32>
      %25 = vector.shape_cast %22 : vector<1x128xf32> to vector<1x1x128xf32>
      tpu.vector_store %arg8[%c0_19, %c0_20, %c0_21], %25 {strides = array<i32>} : memref<1x1x128xf32, #tpu.memory_space<vmem>>, vector<1x1x128xf32>,
    } else {
    }
    return
  }
  func.func @transform_0(%arg0: i32, %arg1: i32, %arg2: i32) -> (i32, i32) {
    %c0_i32 = arith.constant 0 : i32
    return %arg0, %arg2 : i32, i32
  }
  func.func @transform_1(%arg0: i32, %arg1: i32, %arg2: i32) -> (i32, i32) {
    %c0_i32 = arith.constant 0 : i32
    return %arg2, %arg1 : i32, i32
  }
  func.func @transform_2(%arg0: i32, %arg1: i32, %arg2: i32) -> (i32, i32) {
    %c0_i32 = arith.constant 0 : i32
    %c0_i32_0 = arith.constant 0 : i32
    return %c0_i32, %arg1 : i32, i32
  }
  func.func @transform_3(%arg0: i32, %arg1: i32, %arg2: i32) -> (i32, i32) {
    %c0_i32 = arith.constant 0 : i32
    return %arg0, %arg1 : i32, i32
  }
  func.func @transform_4(%arg0: i32, %arg1: i32, %arg2: i32) -> (i32, i32, i32) {
    %c0_i32 = arith.constant 0 : i32
    %c0_i32_0 = arith.constant 0 : i32
    return %arg0, %c0_i32, %arg1 : i32, i32, i32
  }
  func.func @transform_5(%arg0: i32, %arg1: i32, %arg2: i32) -> (i32, i32, i32) {
    %c0_i32 = arith.constant 0 : i32
    %c0_i32_0 = arith.constant 0 : i32
    return %arg0, %c0_i32, %arg1 : i32, i32, i32
  }
}

module attributes {stable_mosaic.version = 11 : i64} {
  func.func @_scale_shift_leaky_kernel(%arg0: i32, %arg1: memref<32x128xbf16, #tpu.memory_space<vmem>>, %arg2: memref<1x128xf32, #tpu.memory_space<vmem>>, %arg3: memref<1x128xf32, #tpu.memory_space<vmem>>, %arg4: memref<32x128xbf16, #tpu.memory_space<vmem>>) attributes {dimension_semantics = [#tpu.dimension_semantics<parallel>], iteration_bounds = array<i64: 1>, scalar_prefetch = 0 : i64, scratch_operands = 0 : i64, tpu.core_type = #tpu.core_type<tc>, window_params = [{transform_indices = @transform_0, window_bounds = array<i64: 32, 128>}, {pipeline_mode = #tpu.pipeline_mode<synchronous>, transform_indices = @transform_1, window_bounds = array<i64: 1, 128>}, {pipeline_mode = #tpu.pipeline_mode<synchronous>, transform_indices = @transform_2, window_bounds = array<i64: 1, 128>}, {transform_indices = @transform_3, window_bounds = array<i64: 32, 128>}]} {
    %c0 = arith.constant 0 : index
    %c0_0 = arith.constant 0 : index
    %0 = vector.load %arg1[%c0, %c0_0] : memref<32x128xbf16, #tpu.memory_space<vmem>>, vector<32x128xbf16>
    %1 = arith.extf %0 : vector<32x128xbf16> to vector<32x128xf32>
    %c0_1 = arith.constant 0 : index
    %c0_2 = arith.constant 0 : index
    %2 = vector.load %arg2[%c0_1, %c0_2] : memref<1x128xf32, #tpu.memory_space<vmem>>, vector<1x128xf32>
    %3 = vector.broadcast %2 : vector<1x128xf32> to vector<32x128xf32>
    %4 = arith.mulf %1, %3 : vector<32x128xf32>
    %c0_3 = arith.constant 0 : index
    %c0_4 = arith.constant 0 : index
    %5 = vector.load %arg3[%c0_3, %c0_4] : memref<1x128xf32, #tpu.memory_space<vmem>>, vector<1x128xf32>
    %6 = vector.broadcast %5 : vector<1x128xf32> to vector<32x128xf32>
    %7 = arith.addf %4, %6 : vector<32x128xf32>
    %cst = arith.constant 0.000000e+00 : f32
    %8 = vector.broadcast %cst : f32 to vector<32x128xf32>
    %9 = arith.cmpf oge, %7, %8 : vector<32x128xf32>
    %cst_5 = arith.constant 2.000000e-01 : f32
    %10 = vector.broadcast %cst_5 : f32 to vector<32x128xf32>
    %11 = arith.mulf %10, %7 : vector<32x128xf32>
    %12 = arith.select %9, %7, %11 : vector<32x128xi1>, vector<32x128xf32>
    %13 = arith.truncf %12 : vector<32x128xf32> to vector<32x128xbf16>
    %c0_6 = arith.constant 0 : index
    %c0_7 = arith.constant 0 : index
    %14 = vector.load %arg4[%c0_6, %c0_7] : memref<32x128xbf16, #tpu.memory_space<vmem>>, vector<32x128xbf16>
    tpu.vector_store %arg4[%c0_6, %c0_7], %13 {strides = array<i32>} : memref<32x128xbf16, #tpu.memory_space<vmem>>, vector<32x128xbf16>,
    return
  }
  func.func @transform_0(%arg0: i32) -> (i32, i32) {
    %c0_i32 = arith.constant 0 : i32
    %c0_i32_0 = arith.constant 0 : i32
    return %arg0, %c0_i32 : i32, i32
  }
  func.func @transform_1(%arg0: i32) -> (i32, i32) {
    %c0_i32 = arith.constant 0 : i32
    %c0_i32_0 = arith.constant 0 : i32
    %c0_i32_1 = arith.constant 0 : i32
    return %c0_i32, %c0_i32_0 : i32, i32
  }
  func.func @transform_2(%arg0: i32) -> (i32, i32) {
    %c0_i32 = arith.constant 0 : i32
    %c0_i32_0 = arith.constant 0 : i32
    %c0_i32_1 = arith.constant 0 : i32
    return %c0_i32, %c0_i32_0 : i32, i32
  }
  func.func @transform_3(%arg0: i32) -> (i32, i32) {
    %c0_i32 = arith.constant 0 : i32
    %c0_i32_0 = arith.constant 0 : i32
    return %arg0, %c0_i32 : i32, i32
  }
}

module attributes {stable_mosaic.version = 11 : i64} {
  func.func @_matmul_bias_kernel(%arg0: i32, %arg1: i32, %arg2: i32, %arg3: memref<16x144xbf16, #tpu.memory_space<vmem>>, %arg4: memref<144x128xbf16, #tpu.memory_space<vmem>>, %arg5: memref<1x128xf32, #tpu.memory_space<vmem>>, %arg6: memref<16x128xf32, #tpu.memory_space<vmem>>, %arg7: memref<16x128xf32, #tpu.memory_space<vmem>>) attributes {dimension_semantics = [#tpu.dimension_semantics<parallel>, #tpu.dimension_semantics<parallel>, #tpu.dimension_semantics<arbitrary>], iteration_bounds = array<i64: 2, 1, 1>, scalar_prefetch = 0 : i64, scratch_operands = 1 : i64, tpu.core_type = #tpu.core_type<tc>, window_params = [{transform_indices = @transform_0, window_bounds = array<i64: 16, 144>}, {transform_indices = @transform_1, window_bounds = array<i64: 144, 128>}, {transform_indices = @transform_2, window_bounds = array<i64: 1, 128>}, {transform_indices = @transform_3, window_bounds = array<i64: 16, 128>}]} {
    %c0_i32 = arith.constant 0 : i32
    %0 = arith.cmpi eq, %arg2, %c0_i32 : i32
    %1 = arith.extui %0 : i1 to i32
    %c0_i32_0 = arith.constant 0 : i32
    %2 = arith.cmpi ne, %1, %c0_i32_0 : i32
    scf.if %2 {
      %c0_10 = arith.constant 0 : index
      %c0_11 = arith.constant 0 : index
      %12 = vector.load %arg5[%c0_10, %c0_11] : memref<1x128xf32, #tpu.memory_space<vmem>>, vector<1x128xf32>
      %13 = vector.shape_cast %12 : vector<1x128xf32> to vector<1x128xf32>
      %14 = vector.broadcast %13 : vector<1x128xf32> to vector<16x128xf32>
      %c0_12 = arith.constant 0 : index
      %c0_13 = arith.constant 0 : index
      %15 = vector.load %arg7[%c0_12, %c0_13] : memref<16x128xf32, #tpu.memory_space<vmem>>, vector<16x128xf32>
      tpu.vector_store %arg7[%c0_12, %c0_13], %14 {strides = array<i32>} : memref<16x128xf32, #tpu.memory_space<vmem>>, vector<16x128xf32>,
    } else {
    }
    %c0 = arith.constant 0 : index
    %c0_1 = arith.constant 0 : index
    %3 = vector.load %arg7[%c0, %c0_1] : memref<16x128xf32, #tpu.memory_space<vmem>>, vector<16x128xf32>
    %c0_2 = arith.constant 0 : index
    %c0_3 = arith.constant 0 : index
    %4 = vector.load %arg3[%c0_2, %c0_3] : memref<16x144xbf16, #tpu.memory_space<vmem>>, vector<16x144xbf16>
    %c0_4 = arith.constant 0 : index
    %c0_5 = arith.constant 0 : index
    %5 = vector.load %arg4[%c0_4, %c0_5] : memref<144x128xbf16, #tpu.memory_space<vmem>>, vector<144x128xbf16>
    %cst = arith.constant dense<0.000000e+00> : vector<16x128xf32>
    %6 = tpu.matmul %4, %5, %cst {dimension_numbers = #tpu.dot_dimension_numbers<[1], [0], [0], [1], [0, 0, 1, 1], [], []>} : vector<16x144xbf16>, vector<144x128xbf16>, vector<16x128xf32> -> vector<16x128xf32>
    %7 = arith.addf %3, %6 : vector<16x128xf32>
    %c0_6 = arith.constant 0 : index
    %c0_7 = arith.constant 0 : index
    %8 = vector.load %arg7[%c0_6, %c0_7] : memref<16x128xf32, #tpu.memory_space<vmem>>, vector<16x128xf32>
    tpu.vector_store %arg7[%c0_6, %c0_7], %7 {strides = array<i32>} : memref<16x128xf32, #tpu.memory_space<vmem>>, vector<16x128xf32>,
    %c0_i32_8 = arith.constant 0 : i32
    %9 = arith.cmpi eq, %arg2, %c0_i32_8 : i32
    %10 = arith.extui %9 : i1 to i32
    %c0_i32_9 = arith.constant 0 : i32
    %11 = arith.cmpi ne, %10, %c0_i32_9 : i32
    scf.if %11 {
      %c0_10 = arith.constant 0 : index
      %c0_11 = arith.constant 0 : index
      %12 = vector.load %arg7[%c0_10, %c0_11] : memref<16x128xf32, #tpu.memory_space<vmem>>, vector<16x128xf32>
      %c0_12 = arith.constant 0 : index
      %c0_13 = arith.constant 0 : index
      %13 = vector.load %arg6[%c0_12, %c0_13] : memref<16x128xf32, #tpu.memory_space<vmem>>, vector<16x128xf32>
      tpu.vector_store %arg6[%c0_12, %c0_13], %12 {strides = array<i32>} : memref<16x128xf32, #tpu.memory_space<vmem>>, vector<16x128xf32>,
    } else {
    }
    return
  }
  func.func @transform_0(%arg0: i32, %arg1: i32, %arg2: i32) -> (i32, i32) {
    %c0_i32 = arith.constant 0 : i32
    return %arg0, %arg2 : i32, i32
  }
  func.func @transform_1(%arg0: i32, %arg1: i32, %arg2: i32) -> (i32, i32) {
    %c0_i32 = arith.constant 0 : i32
    return %arg2, %arg1 : i32, i32
  }
  func.func @transform_2(%arg0: i32, %arg1: i32, %arg2: i32) -> (i32, i32) {
    %c0_i32 = arith.constant 0 : i32
    %c0_i32_0 = arith.constant 0 : i32
    return %c0_i32, %arg1 : i32, i32
  }
  func.func @transform_3(%arg0: i32, %arg1: i32, %arg2: i32) -> (i32, i32) {
    %c0_i32 = arith.constant 0 : i32
    return %arg0, %arg1 : i32, i32
  }
}

</mosaic_0001>

<bundles_post_ra>
// kernel: disblock_forward.4
= control target key start
LH: loop header
LB: loop body
LE: loop exit
PB: predicated region body
PF: predicated region fallthrough
CT: control target
= control target key end

     0   :  { %8 = vsyncpa [#allocation4], 0  ;;  %s1320_s0 = inlined_call_operand.hbm [shape: bf16[128,64], index: 0, kind: input, shape index: {}]   ;;  %s1321_s1 = inlined_call_operand.hbm [shape: bf16[64,128], index: 1, kind: input, shape index: {}]   ;;  %s1322_s2 = inlined_call_operand.hbm [shape: f32[1,128], index: 2, kind: input, shape index: {}]   ;;  %s1323_s3 = inlined_call_operand.hbm [shape: bf16[128,128], index: 3, kind: output, shape index: {}]  }
   0x1   :  { %10 = vsyncpa [#allocation4 + $0x1], 0 }
   0x2   :  { %11 = vsyncpa [#allocation7], 0 }
   0x3   :  { %12 = vsyncpa [#allocation5], 0 }
   0x4   :  { %14 = vsyncpa [#allocation5 + $0x1], 0  ;;  %s1048_s12 = smov 0   ;;  %s1050_s13 = smov 0  }
   0x5   :  { %s1052_s14 = smov 0   ;;  %s1054_s15 = smov 0  }
   0x6   :  { %s1056_s16 = smov 0   ;;  %s1058_s17 = smov 0  }
   0x7 LB: > { %s646_s18 = sadd.s32 4294967295, %s1018_s17   ;;  %s647_s19 = sadd.s32 4294967294, %s1018_s17   ;;  %s1018_s17 = sphi %s1058_s17, %s20_s17   ;;  %s1014_s16 = sphi %s1056_s16, %s1345_s16   ;;  %s1010_s15 = sphi %s1054_s15, %s1344_s15   ;;  %s1006_s14 = sphi %s1052_s14, %s1343_s14   ;;  %s1002_s13 = sphi %s1050_s13, %s1342_s13   ;;  %s998_s12 = sphi %s1048_s12, %s1341_s12  }
   0x8   : > { %p61_p0 = scmp.ne.s32.totalorder %s1002_s13, %s998_s12  ;;  %p1082_p1 = scmp.eq.s32.totalorder %s646_s18, 0 }
   0x9   : > { %p1086_p2 = scmp.eq.s32.totalorder %s646_s18, 1  ;;  %p147_p3 = scmp.eq.s32.totalorder %s647_s19, 1 }
   0xa   : > { %s1328_s20 = scalar_select %p1082_p1, 1, 0 }
   0xb   : > { %p1092_p4 = por %p1082_p1, %p61_p0  ;;  %p648_p5 = scmp.ge.s32.totalorder %s1018_s17, 1 }
   0xc   : > { %p1097_p6 = por %p147_p3, %p61_p0  ;;  %p154_p7 = scmp.lt.s32.totalorder %s1018_s17, 3 }
   0xd   : > { %s1330_s22 = scalar_select %p1092_p4, 1, 0 }
   0xe   : > { %s1331_s23 = scalar_select %p1097_p6, 1, 0 }
   0xf   : > { %p1102_p8 = pnand %p648_p5, %p154_p7  ;;  %s1020_s25 = smov [#allocation6]  }
  0x10   : > { %s170_s26 = sshll.u32 %s1020_s25, 4  ;;  %s1021_s28 = smov [#allocation8]   ;;  %s1106_s26 = int_to_ptr.vmem [resolvable:$true] %s170_s26 }
  0x11   : > { %p763_p9 = pneg %p1102_p8  ;;  %s186_s29 = sshll.u32 %s1021_s28, 4  ;;  %s1117_s29 = int_to_ptr.vmem [resolvable:$true] %s186_s29 }
  0x12   : > { %s846_s5 = scalar_lea.hbm %s1321_s1, 512 }
  0x13   : > { %p1113_p11 = pnand %p763_p9, %p1082_p1  ;;  %p847_p12 = scmp.ne.s32.totalorder %s1321_s1, %s846_s5 }
  0x14   : > { %p853_p5 = scmp.lt.u32.totalorder %s846_s5, %s1321_s1 }
  0x15   : > { %p848_p13 = pneg %p1113_p11 }
  0x17   : > { %p849_p0 = pnand %p848_p13, %p847_p12 }
  0x19   : > { %p850_p3 = pneg %p849_p0 }
  0x1b   : > { %p855_p7 = pnand %p853_p5, %p850_p3 }
  0x1d   : > { %858 = shalt.err (!%p855_p7)
}
  0x1e   : > { %s859_s10 = scalar_lea.vmem %s1106_s26, 512  ;;  %p867_p1 = scmp.lt.s32.totalorder %s1106_s26, %s1106_s26 }
  0x1f   : > { %p860_p9 = scmp.ne.s32.totalorder %s1106_s26, %s859_s10  ;;  %p868_p12 = scmp.lt.s32.totalorder %s859_s10, %s859_s10 }
  0x21   : > { %p862_p10 = pnand %p860_p9, %p848_p13  ;;  %p869_p0 = por %p868_p12, %p867_p1 }
  0x23   : > { %p863_p6 = pneg %p862_p10 }
  0x25   : > { %p870_p4 = pnand %p869_p0, %p863_p6 }
  0x27   : > { %873 = shalt.err (!%p870_p4)
}
  0x28   : > { %s1022_s11 = smov 64   ;;  %s1023_s18 = smov 4  }
  0x29   : > { %766 = dma.hbm_to_vmem [thread:$0]  (!%p1113_p11), %s1321_s1, 512, %s1106_s26, [#allocation7], %s1022_s11, %s1022_s11, %s1023_s18  }
  0x2a   : > { %s874_s4 = scalar_lea.hbm %s1322_s2, 16 }
  0x2b   : > { %p875_p1 = scmp.ne.s32.totalorder %s1322_s2, %s874_s4  ;;  %p881_p10 = scmp.lt.u32.totalorder %s874_s4, %s1322_s2 }
  0x2d   : > { %p877_p4 = pnand %p875_p1, %p848_p13 }
  0x2f   : > { %p878_p6 = pneg %p877_p4 }
  0x31   : > { %p883_p3 = pnand %p881_p10, %p878_p6 }
  0x33   : > { %886 = shalt.err (!%p883_p3)
}
  0x34   : > { %s887_s26 = scalar_lea.vmem %s1117_s29, 16  ;;  %s894_s9 = scalar_lea.vmem %s1117_s29, 32 }
  0x35   : > { %p888_p5 = scmp.ne.s32.totalorder %s1117_s29, %s887_s26  ;;  %p895_p12 = scmp.lt.s32.totalorder %s1117_s29, %s1117_s29 }
  0x36   : > { %p896_p0 = scmp.lt.s32.totalorder %s894_s9, %s887_s26 }
  0x37   : > { %p890_p7 = pnand %p888_p5, %p848_p13 }
  0x38   : > { %p897_p1 = por %p896_p0, %p895_p12 }
  0x39   : > { %p891_p9 = pneg %p890_p7 }
  0x3b   : > { %p898_p4 = pnand %p897_p1, %p891_p9 }
  0x3d   : > { %901 = shalt.err (!%p898_p4)
}
  0x3e   : > { %769 = dma.hbm_to_vmem [thread:$0]  (!%p1113_p11), %s1322_s2, 16, %s1117_s29, [#allocation7]  }
  0x3f   : > { %s39_s25 = sadd.s32 1, %s1014_s16  ;;  %s48_s28 = sadd.s32 1, %s1006_s14 }
  0x40   : > { %p41_p13 = scmp.ge.s32.totalorder %s39_s25, 2  ;;  %p55_p6 = scmp.ne.s32.totalorder %s1006_s14, %s1002_s13 }
  0x41   : > { %p56_p10 = scmp.eq.s32.totalorder %s1018_s17, 0  ;;  %p780_p3 = scmp.lt.s32.totalorder %s1018_s17, 2 }
  0x42   : > { %s1347_s25 = smov (%p41_p13, %s39_s25), 0  ;;  %p1185_p7 = por %p1086_p2, %p55_p6 }
  0x43   : > { %p57_p5 = por %p56_p10, %p55_p6  ;;  %s43_s30 = ssub.s32 %s1014_s16, %s1347_s25 }
  0x44   : > { %s1334_s27 = scalar_select %p1185_p7, 1, 0 }
  0x45   : > { %s197_s4 = sand.u32 1, %s1006_s14   ;;  %p46_p9 = scmp.eq.s32.totalorder %s43_s30, 0 }
  0x46   : > { %s652_s29 = sshll.u32 %s197_s4, 5  ;;  %s686_s5 = sshll.u32 %s1014_s16, 9 }
  0x47   : > { %s1194_s6 = scalar_select %p46_p9, %s1006_s14, %s48_s28  }
  0x48   : > { %s1199_s26 = scalar_lea.hbm %s1320_s0, %s686_s5  ;;  %s201_s21 = scalar_lea.vmem [#allocation3], %s652_s29 }
  0x49   : > { %s209_s9 = sshll.u32 %s201_s21, 4  ;;  %p1203_p2 = pnand %p780_p3, %p57_p5  ;;  %s1207_s9 = int_to_ptr.vmem [resolvable:$true] %s209_s9 }
  0x4a   : > { %s1209_s19 = scalar_lea.sflag [#allocation4], %s197_s4  ;;  %s902_s28 = scalar_lea.hbm %s1199_s26, 512 }
  0x4b   : > { %p903_p11 = scmp.ne.s32.totalorder %s1199_s26, %s902_s28  ;;  %p904_p12 = pneg %p1203_p2 }
  0x4c   : > { %s907_s5 = scalar_lea.hbm %s1320_s0, 1024  ;;  %p908_p4 = scmp.lt.u32.totalorder %s1199_s26, %s1320_s0 }
  0x4d   : > { %p905_p0 = pnand %p904_p12, %p903_p11  ;;  %p909_p13 = scmp.lt.u32.totalorder %s907_s5, %s902_s28 }
  0x4e   : > { %p911_p10 = scmp.lt.u32.totalorder %s902_s28, %s1199_s26 }
  0x4f   : > { %p906_p1 = pneg %p905_p0  ;;  %p910_p6 = por %p909_p13, %p908_p4 }
  0x51   : > { %p912_p3 = por %p911_p10, %p910_p6 }
  0x53   : > { %p913_p5 = pnand %p912_p3, %p906_p1 }
  0x55   : > { %916 = shalt.err (!%p913_p5)
}
  0x56   : > { %s917_s4 = scalar_lea.vmem %s1207_s9, 512  ;;  %s1024_s21 = smov [#allocation3]  }
  0x57   : > { %p918_p9 = scmp.ne.s32.totalorder %s1207_s9, %s917_s4  ;;  %s922_s30 = sshll.u32 %s1024_s21, 4  ;;  %s923_s30 = int_to_ptr.vmem [resolvable:$false] %s922_s30 }
  0x58   : > { %s924_s29 = scalar_lea.vmem %s923_s30, 1024  ;;  %p925_p7 = scmp.lt.s32.totalorder %s1207_s9, %s923_s30 }
  0x59   : > { %p920_p11 = pnand %p918_p9, %p904_p12  ;;  %p926_p4 = scmp.lt.s32.totalorder %s924_s29, %s917_s4 }
  0x5b   : > { %p921_p0 = pneg %p920_p11  ;;  %p927_p13 = por %p926_p4, %p925_p7 }
  0x5d   : > { %p928_p6 = pnand %p927_p13, %p921_p0 }
  0x5f   : > { %931 = shalt.err (!%p928_p6)
}
  0x60   : > { %773 = dma.hbm_to_vmem [thread:$0]  (!%p1203_p2), %s1199_s26, 512, %s1207_s9, %s1209_s19, %s1022_s11, %s1022_s11, %s1023_s18  }
  0x61   : > { %221 = sbr.rel (%p1102_p8) target bundleno = 364 (0x16c), region = 32  ;;  %s1243_s28 = sand.u32 (!%p1102_p8), 1, %s1002_s13  }
  0x62   : > { %s656_s5 = sshll.u32 (!%p1102_p8), %s1243_s28, 5  ;;  %s224_s7 = scalar_lea.sflag (!%p1102_p8), [#allocation4], %s1243_s28 }
  0x63   : > { %s227_s10 = scalar_lea.vmem (!%p1102_p8), [#allocation3], %s656_s5  ;;  %p1336_p7 = scmp.ne.s32.totalorder (!%p1102_p8), %s1330_s22, 0 }
  0x68   : > { %985 = dma.done.wait (%p1336_p7), %s224_s7, 512  }
  0x69   : > { %987 = vsyncadd (%p1336_p7), %s224_s7, 4294966784  ;;  %p1337_p2 = scmp.ne.s32.totalorder %s1328_s20, 0 }
  0x6b   : > { %989 = dma.done.wait (%p1337_p2), [#allocation7], 528  }
  0x6c   : > { %991 = vsyncadd (%p1337_p2), [#allocation7], 4294966768  ;;  %v838_v0 = vld [vmem:[#allocation6] sm:$0xff]   ;;  %v839_v1 = vld [vmem:[#allocation6 + $0x8] sm:$0xff]   ;;  %vm349_vm0 = vcmask 523264   ;;  %s257_s20 = scalar_lea.vmem [#allocation9], %s656_s5 }
  0x6d   : > { %727 = vmatprep.subr.bf16.mxu0 %v838_v0  ;;  %743 = vmatprep.subr.bf16.mxu1 %v838_v0  ;;  %v840_v2 = vld [vmem:[#allocation6 + $0x10] sm:$0xff]   ;;  %v842_v3 = vld [vmem:[%s227_s10] sm:$0xff]   ;;  %v841_v5 = vld [vmem:[#allocation6 + $0x18] sm:$0xff]   ;;  %s533_s22 = sshll.u32 %s257_s20, 4  ;;  %s695_s24 = sshll.u32 %s1010_s15, 9  ;;  %s1266_s22 = int_to_ptr.vmem [resolvable:$true] %s533_s22 }
  0x6e   : > { %728 = vmatpush3.bf16.msra.mxu0 %v838_v0  ;;  %747 = vmatpush3.bf16.msra.mxu1 %v838_v0  ;;  %v843_v4 = vld [vmem:[%s227_s10 + $0x10] sm:$0xff]   ;;  %v844_v6 = vld [vmem:[%s227_s10 + $0x8] sm:$0xff]   ;;  %v845_v7 = vld [vmem:[%s227_s10 + $0x18] sm:$0xff]   ;;  %s1271_s18 = scalar_lea.hbm %s1323_s3, %s695_s24  ;;  %s519_s26 = scalar_lea.sflag [#allocation5], %s1243_s28 }
  0x6f   : > { %729 = vmatprep.subr.bf16.mxu0 %v839_v1  ;;  %744 = vmatprep.subr.bf16.mxu1 %v839_v1  ;;  %v660_v8 = vld [vmem:[#allocation8] ss:$0 sm:$0xff]  ;;  %s932_s9 = scalar_lea.vmem %s1266_s22, 512  ;;  %p1338_p12 = scmp.ne.s32.totalorder %s1334_s27, 0 }
  0x70   : > { %735 = vmatprep.mubr.msk.bf16.mxu0 %vm349_vm0, %v842_v3  ;;  %739 = vmatprep.mubr.msk.bf16.mxu1 %vm349_vm0, %v843_v4  ;;  %p933_p8 = scmp.ne.s32.totalorder %s1266_s22, %s932_s9  ;;  %s1025_s19 = smov [#allocation9]  }
  0x71   : > { %s936_s8 = sshll.u32 %s1025_s19, 4  ;;  %s937_s8 = int_to_ptr.vmem [resolvable:$false] %s936_s8 }
  0x72   : > { %730 = vmatpush3.bf16.msra.mxu0 %v839_v1  ;;  %748 = vmatpush3.bf16.msra.mxu1 %v839_v1  ;;  %p934_p1 = pnand %p933_p8, %p1338_p12  ;;  %s938_s4 = scalar_lea.vmem %s937_s8, 1024 }
  0x73   : > { %731 = vmatprep.subr.bf16.mxu0 %v840_v2  ;;  %745 = vmatprep.subr.bf16.mxu1 %v840_v2  ;;  %p939_p3 = scmp.lt.s32.totalorder %s1266_s22, %s937_s8  ;;  %p940_p5 = scmp.lt.s32.totalorder %s938_s4, %s932_s9 }
  0x74   : > { %p935_p10 = pneg %p934_p1 }
  0x75   : > { %p941_p9 = por %p940_p5, %p939_p3 }
  0x76   : > { %732 = vmatpush3.bf16.msra.mxu0 %v840_v2  ;;  %749 = vmatpush3.bf16.msra.mxu1 %v840_v2 }
  0x77   : > { %733 = vmatprep.subr.bf16.mxu0 %v841_v5  ;;  %746 = vmatprep.subr.bf16.mxu1 %v841_v5  ;;  %p942_p11 = pnand %p941_p9, %p935_p10 }
  0x7a   : > { %734 = vmatpush3.bf16.msra.mxu0 %v841_v5  ;;  %750 = vmatpush3.bf16.msra.mxu1 %v841_v5 }
  0x7d   : > { %736 = vmatmul.mubr.msk.bf16.vlgmr.msra.gmra.mrb[0].mxu0 %vm349_vm0, %v844_v6  ;;  %740 = vmatmul.mubr.msk.bf16.vlgmr.msra.gmra.mrb[0].mxu1 %vm349_vm0, %v845_v7 }
 0x150   : > { %v737_v9 = vpop.f32.mrb[0].mxu0  ;;  %v741_v10 = vpop.f32.mrb[0].mxu1 }
 0x151   : > { %v429_v11 = vadd.f32 %v737_v9, %v660_v8  ;;  %v433_v12 = vadd.f32 %v741_v10, %v660_v8  ;;  %v396_v13 = vpop.f32.mrb[1].mxu0  ;;  %v412_v14 = vpop.f32.mrb[1].mxu1 }
 0x152   : > { %v427_v15 = vadd.f32 %v660_v8, %v396_v13  ;;  %v431_v16 = vadd.f32 %v660_v8, %v412_v14  ;;  %v738_v17 = vpop.f32.mrb[2].mxu0  ;;  %v742_v18 = vpop.f32.mrb[2].mxu1 }
 0x153   : > { %vm456_vm1 = vcmp.ge.f32.partialorder %v429_v11, 0.0  ;;  %v464_v19 = vmul.f32 0.2, %v429_v11  ;;  %vm460_vm2 = vcmp.ge.f32.partialorder %v433_v12, 0.0  ;;  %v468_v20 = vmul.f32 0.2, %v433_v12 }
 0x154   : > { %vm454_vm3 = vcmp.ge.f32.partialorder %v427_v15, 0.0  ;;  %v462_v21 = vmul.f32 0.2, %v427_v15  ;;  %vm458_vm4 = vcmp.ge.f32.partialorder %v431_v16, 0.0  ;;  %v466_v22 = vmul.f32 0.2, %v431_v16 }
 0x155   : > { %v430_v23 = vadd.f32 %v738_v17, %v660_v8  ;;  %v434_v24 = vadd.f32 %v742_v18, %v660_v8  ;;  %v399_v25 = vpop.f32.mrb[3].mxu0  ;;  %v415_v26 = vpop.f32.mrb[3].mxu1  ;;  %v472_v27 = vsel %vm456_vm1, %v429_v11, %v464_v19  ;;  %v476_v28 = vsel %vm460_vm2, %v433_v12, %v468_v20 }
 0x156   : > { %v428_v29 = vadd.f32 %v660_v8, %v399_v25  ;;  %v432_v30 = vadd.f32 %v660_v8, %v415_v26  ;;  %v470_v35 = vsel %vm454_vm3, %v427_v15, %v462_v21  ;;  %v474_v36 = vsel %vm458_vm4, %v431_v16, %v466_v22 }
 0x157   : > { %vm457_vm5 = vcmp.ge.f32.partialorder %v430_v23, 0.0  ;;  %v465_v31 = vmul.f32 0.2, %v430_v23  ;;  %vm461_vm6 = vcmp.ge.f32.partialorder %v434_v24, 0.0  ;;  %v469_v32 = vmul.f32 0.2, %v434_v24 }
 0x158   : > { %vm455_vm7 = vcmp.ge.f32.partialorder %v428_v29, 0.0  ;;  %v463_v33 = vmul.f32 0.2, %v428_v29  ;;  %vm459_vm8 = vcmp.ge.f32.partialorder %v432_v30, 0.0  ;;  %v467_v34 = vmul.f32 0.2, %v432_v30 }
 0x159   : > { %v473_v37 = vsel %vm457_vm5, %v430_v23, %v465_v31  ;;  %v477_v38 = vsel %vm461_vm6, %v434_v24, %v469_v32 }
 0x15a   : > { %v704_v39 = vpack.c.bf16 %v473_v37, %v472_v27  ;;  %v714_v40 = vpack.c.bf16 %v477_v38, %v476_v28  ;;  %v471_v41 = vsel %vm455_vm7, %v428_v29, %v463_v33  ;;  %v475_v42 = vsel %vm459_vm8, %v432_v30, %v467_v34 }
 0x15b   : > { %v699_v43 = vpack.c.bf16 %v471_v41, %v470_v35  ;;  %v709_v44 = vpack.c.bf16 %v475_v42, %v474_v36 }
 0x15c   : > { %716 = vst [vmem:[%s257_s20 + $0x8] sm:$0xff] %v704_v39   ;;  %718 = vst [vmem:[%s257_s20 + $0x18] sm:$0xff] %v714_v40  }
 0x15d   : > { %700 = vst [vmem:[%s257_s20] sm:$0xff] %v699_v43   ;;  %717 = vst [vmem:[%s257_s20 + $0x10] sm:$0xff] %v709_v44  }
 0x15e   : > { %945 = shalt.err (!%p942_p11)
}
 0x15f   : > { %s946_s21 = scalar_lea.hbm %s1271_s18, 512  ;;  %s950_s5 = scalar_lea.hbm %s1323_s3, 1024 }
 0x160   : > { %p947_p0 = scmp.ne.s32.totalorder %s1271_s18, %s946_s21  ;;  %p951_p6 = scmp.lt.u32.totalorder %s1271_s18, %s1323_s3 }
 0x161   : > { %p952_p7 = scmp.lt.u32.totalorder %s950_s5, %s946_s21  ;;  %p954_p8 = scmp.lt.u32.totalorder %s946_s21, %s1271_s18 }
 0x162   : > { %p948_p4 = pnand %p947_p0, %p1338_p12 }
 0x163   : > { %p953_p2 = por %p952_p7, %p951_p6 }
 0x164   : > { %p949_p13 = pneg %p948_p4 }
 0x165   : > { %p955_p1 = por %p954_p8, %p953_p2 }
 0x167   : > { %p956_p10 = pnand %p955_p1, %p949_p13 }
 0x169   : > { %959 = shalt.err (!%p956_p10)
}
 0x16a   : > { %s1026_s20 = smov 64   ;;  %s1027_s24 = smov 4  }
 0x16b   : > { %761 = dma.vmem_to_hbm [thread:$0]  (%p1338_p12), %s1266_s22, 512, %s1271_s18, %s519_s26, %s1026_s20, %s1026_s20, %s1027_s24  }
 0x16c PF: > { %s548_s15 = sand.u32 1, %s998_s12   ;;  %p1339_p3 = scmp.ne.s32.totalorder %s1331_s23, 0 }
 0x16d   : > { %p1340_p5 = scmp.ge.s32.totalorder %s1018_s17, 2  ;;  %s549_s11 = scalar_lea.sflag [#allocation5], %s548_s15 }
 0x16f   : > { %p775_p9 = pnand %p1340_p5, %p1339_p3 }
 0x171   : > { %993 = dma.done.wait (!%p775_p9), %s549_s11, 512  }
 0x172   : > { %995 = vsyncadd (!%p775_p9), %s549_s11, 4294966784  ;;  %s20_s17 = sadd.s32 1, %s1018_s17   ;;  %s1341_s12 = smov %s1002_s13 }
 0x173   : > { %p17_p11 = scmp.ge.s32.totalorder %s20_s17, 4   ;;  %s1342_s13 = smov %s1006_s14 }
 0x174   : > { %s1343_s14 = smov %s1194_s6  ;;  %s1344_s15 = smov %s1014_s16 }
 0x175   : > { %s1345_s16 = smov %s1347_s25  ;;  %19 = sbr.rel (!%p17_p11) target bundleno = 7 (0x7), region = 95 }
 0x17c   :  { %554 = vsyncpa [#allocation4], 1 }
 0x17d   :  { %556 = vsyncpa [#allocation4 + $0x1], 1 }
 0x17e   :  { %557 = vsyncpa [#allocation7], 1 }
 0x17f   :  { %558 = vsyncpa [#allocation5], 1 }
 0x180   :  { %560 = vsyncpa [#allocation5 + $0x1], 1 }

// kernel: disblock_forward.5
= control target key start
LH: loop header
LB: loop body
LE: loop exit
PB: predicated region body
PF: predicated region fallthrough
CT: control target
= control target key end

     0   :  { %11 = vsyncpa [#allocation4], 0  ;;  %s1512_s0 = inlined_call_operand.hbm [shape: bf16[32,128], index: 0, kind: input, shape index: {}]   ;;  %s1513_s1 = inlined_call_operand.hbm [shape: bf16[128,128], index: 1, kind: input, shape index: {}]   ;;  %s1514_s2 = inlined_call_operand.hbm [shape: f32[1,128], index: 2, kind: input, shape index: {}]   ;;  %s1515_s3 = inlined_call_operand.hbm [shape: bf16[32,128], index: 3, kind: output, shape index: {0}]   ;;  %s1516_s4 = inlined_call_operand.hbm [shape: f32[2,1,128], index: 4, kind: output, shape index: {1}]   ;;  %s1517_s5 = inlined_call_operand.hbm [shape: f32[2,1,128], index: 5, kind: output, shape index: {2}]  }
   0x1   :  { %13 = vsyncpa [#allocation4 + $0x1], 0 }
   0x2   :  { %14 = vsyncpa [#allocation7], 0 }
   0x3   :  { %15 = vsyncpa [#allocation5], 0 }
   0x4   :  { %17 = vsyncpa [#allocation5 + $0x1], 0 }
   0x5   :  { %18 = vsyncpa [#allocation11], 0 }
   0x6   :  { %20 = vsyncpa [#allocation11 + $0x1], 0  ;;  %s1175_s18 = smov 0   ;;  %s1177_s19 = smov 0  }
   0x7   :  { %s1179_s20 = smov 0   ;;  %s1181_s21 = smov 0  }
   0x8   :  { %s1183_s22 = smov 0   ;;  %s1185_s23 = smov 0  }
   0x9 LB: > { %s1206_s24 = sadd.s32 4294967295, %s1131_s23   ;;  %s1519_s25 = sadd.s32 4294967294, %s1131_s23   ;;  %s1131_s23 = sphi %s1185_s23, %s26_s23   ;;  %s1127_s22 = sphi %s1183_s22, %s1542_s22   ;;  %s1123_s21 = sphi %s1181_s21, %s1541_s21   ;;  %s1119_s20 = sphi %s1179_s20, %s1540_s20   ;;  %s1115_s19 = sphi %s1177_s19, %s1539_s19   ;;  %s1111_s18 = sphi %s1175_s18, %s1538_s18  }
   0xa   : > { %p67_p0 = scmp.ne.s32.totalorder %s1115_s19, %s1111_s18  ;;  %p1518_p1 = scmp.eq.s32.totalorder %s1206_s24, 0 }
   0xb   : > { %p153_p3 = scmp.eq.s32.totalorder %s1519_s25, 1  ;;  %p722_p5 = scmp.ge.s32.totalorder %s1131_s23, 1 }
   0xc   : > { %p1217_p4 = por %p1518_p1, %p67_p0  ;;  %p216_p7 = scmp.lt.s32.totalorder %s1131_s23, 3 }
   0xd   : > { %p1222_p6 = por %p153_p3, %p67_p0  ;;  %s1133_s29 = smov [#allocation6]  }
   0xe   : > { %s1523_s26 = scalar_select %p1217_p4, 1, 0 }
   0xf   : > { %s1524_s27 = scalar_select %p1222_p6, 1, 0 }
  0x10   : > { %p1227_p8 = pnand %p722_p5, %p216_p7  ;;  %s232_s30 = sshll.u32 %s1133_s29, 4  ;;  %s1231_s30 = int_to_ptr.vmem [resolvable:$true] %s232_s30 }
  0x11   : > { %s1134_s7 = smov [#allocation8]   ;;  %s899_s11 = scalar_lea.hbm %s1513_s1, 1024 }
  0x12   : > { %p807_p9 = pneg %p1227_p8  ;;  %s248_s8 = sshll.u32 %s1134_s7, 4  ;;  %s1242_s8 = int_to_ptr.vmem [resolvable:$true] %s248_s8 }
  0x13   : > { %p900_p12 = scmp.ne.s32.totalorder %s1513_s1, %s899_s11  ;;  %p906_p5 = scmp.lt.u32.totalorder %s899_s11, %s1513_s1 }
  0x14   : > { %p1238_p11 = pnand %p807_p9, %p1518_p1 }
  0x16   : > { %p901_p13 = pneg %p1238_p11 }
  0x18   : > { %p902_p0 = pnand %p901_p13, %p900_p12 }
  0x1a   : > { %p903_p3 = pneg %p902_p0 }
  0x1c   : > { %p908_p7 = pnand %p906_p5, %p903_p3 }
  0x1e   : > { %911 = shalt.err (!%p908_p7)
}
  0x1f   : > { %s912_s16 = scalar_lea.vmem %s1231_s30, 1024  ;;  %p920_p2 = scmp.lt.s32.totalorder %s1231_s30, %s1231_s30 }
  0x20   : > { %p913_p9 = scmp.ne.s32.totalorder %s1231_s30, %s912_s16  ;;  %p921_p12 = scmp.lt.s32.totalorder %s912_s16, %s912_s16 }
  0x22   : > { %p915_p10 = pnand %p913_p9, %p901_p13  ;;  %p922_p0 = por %p921_p12, %p920_p2 }
  0x24   : > { %p916_p1 = pneg %p915_p10 }
  0x26   : > { %p923_p6 = pnand %p922_p0, %p916_p1 }
  0x28   : > { %926 = shalt.err (!%p923_p6)
}
  0x29   : > { %s1520_s17 = smov 64   ;;  %s1136_s29 = smov 4  }
  0x2a   : > { %810 = dma.hbm_to_vmem [thread:$0]  (!%p1238_p11), %s1513_s1, 1024, %s1231_s30, [#allocation7], %s1520_s17, %s1520_s17, %s1136_s29  }
  0x2b   : > { %s927_s12 = scalar_lea.hbm %s1514_s2, 16 }
  0x2c   : > { %p928_p1 = scmp.ne.s32.totalorder %s1514_s2, %s927_s12  ;;  %p934_p10 = scmp.lt.u32.totalorder %s927_s12, %s1514_s2 }
  0x2e   : > { %p930_p2 = pnand %p928_p1, %p901_p13 }
  0x30   : > { %p931_p6 = pneg %p930_p2 }
  0x32   : > { %p936_p3 = pnand %p934_p10, %p931_p6 }
  0x34   : > { %939 = shalt.err (!%p936_p3)
}
  0x35   : > { %s940_s30 = scalar_lea.vmem %s1242_s8, 16  ;;  %s947_s7 = scalar_lea.vmem %s1242_s8, 32 }
  0x36   : > { %p941_p5 = scmp.ne.s32.totalorder %s1242_s8, %s940_s30  ;;  %p948_p12 = scmp.lt.s32.totalorder %s1242_s8, %s1242_s8 }
  0x37   : > { %p949_p0 = scmp.lt.s32.totalorder %s947_s7, %s940_s30 }
  0x38   : > { %p943_p7 = pnand %p941_p5, %p901_p13 }
  0x39   : > { %p950_p1 = por %p949_p0, %p948_p12 }
  0x3a   : > { %p944_p9 = pneg %p943_p7 }
  0x3c   : > { %p951_p2 = pnand %p950_p1, %p944_p9 }
  0x3e   : > { %954 = shalt.err (!%p951_p2)
}
  0x3f   : > { %813 = dma.hbm_to_vmem [thread:$0]  (!%p1238_p11), %s1514_s2, 16, %s1242_s8, [#allocation7]  }
  0x40   : > { %s45_s11 = sadd.s32 1, %s1127_s22  ;;  %s54_s12 = sadd.s32 1, %s1119_s20 }
  0x41   : > { %p47_p13 = scmp.ge.s32.totalorder %s45_s11, 2  ;;  %p61_p6 = scmp.ne.s32.totalorder %s1119_s20, %s1115_s19 }
  0x42   : > { %p62_p10 = scmp.eq.s32.totalorder %s1131_s23, 0  ;;  %p830_p3 = scmp.lt.s32.totalorder %s1131_s23, 2 }
  0x43   : > { %s1544_s11 = smov (%p47_p13, %s45_s11), 0  ;;  %p1527_p7 = scmp.eq.s32.totalorder %s1206_s24, 1 }
  0x44   : > { %p63_p5 = por %p62_p10, %p61_p6  ;;  %s49_s13 = ssub.s32 %s1127_s22, %s1544_s11 }
  0x45   : > { %p1310_p9 = por %p1527_p7, %p61_p6  ;;  %s259_s14 = sand.u32 1, %s1119_s20  }
  0x46   : > { %p52_p12 = scmp.eq.s32.totalorder %s49_s13, 0  ;;  %s726_s8 = sshll.u32 %s259_s14, 3 }
  0x47   : > { %s1528_s6 = scalar_select %p1310_p9, 1, 0 }
  0x48   : > { %s753_s15 = sshll.u32 %s1127_s22, 7  ;;  %s263_s10 = scalar_lea.vmem [#allocation3], %s726_s8 }
  0x49   : > { %s1319_s16 = scalar_select %p52_p12, %s1119_s20, %s54_s12  }
  0x4a   : > { %s1324_s9 = scalar_lea.hbm %s1512_s0, %s753_s15  ;;  %s271_s25 = sshll.u32 %s263_s10, 4  ;;  %s1332_s25 = int_to_ptr.vmem [resolvable:$true] %s271_s25 }
  0x4b   : > { %p1328_p11 = pnand %p830_p3, %p63_p5  ;;  %s1334_s12 = scalar_lea.sflag [#allocation4], %s259_s14 }
  0x4c   : > { %s955_s13 = scalar_lea.hbm %s1324_s9, 128  ;;  %s960_s30 = scalar_lea.hbm %s1512_s0, 256 }
  0x4d   : > { %p956_p0 = scmp.ne.s32.totalorder %s1324_s9, %s955_s13  ;;  %p957_p1 = pneg %p1328_p11 }
  0x4e   : > { %p961_p6 = scmp.lt.u32.totalorder %s1324_s9, %s1512_s0  ;;  %p962_p10 = scmp.lt.u32.totalorder %s960_s30, %s955_s13 }
  0x4f   : > { %p958_p2 = pnand %p957_p1, %p956_p0  ;;  %p964_p5 = scmp.lt.u32.totalorder %s955_s13, %s1324_s9 }
  0x50   : > { %p963_p3 = por %p962_p10, %p961_p6 }
  0x51   : > { %p959_p13 = pneg %p958_p2 }
  0x52   : > { %p965_p7 = por %p964_p5, %p963_p3 }
  0x54   : > { %p966_p12 = pnand %p965_p7, %p959_p13 }
  0x56   : > { %969 = shalt.err (!%p966_p12)
}
  0x57   : > { %s970_s14 = scalar_lea.vmem %s1332_s25, 128  ;;  %s1137_s8 = smov [#allocation3]  }
  0x58   : > { %p971_p0 = scmp.ne.s32.totalorder %s1332_s25, %s970_s14  ;;  %s975_s15 = sshll.u32 %s1137_s8, 4  ;;  %s976_s15 = int_to_ptr.vmem [resolvable:$false] %s975_s15 }
  0x59   : > { %s977_s7 = scalar_lea.vmem %s976_s15, 256  ;;  %p978_p4 = scmp.lt.s32.totalorder %s1332_s25, %s976_s15 }
  0x5a   : > { %p973_p2 = pnand %p971_p0, %p957_p1  ;;  %p979_p6 = scmp.lt.s32.totalorder %s977_s7, %s970_s14 }
  0x5c   : > { %p974_p9 = pneg %p973_p2  ;;  %p980_p10 = por %p979_p6, %p978_p4 }
  0x5e   : > { %p981_p3 = pnand %p980_p10, %p974_p9 }
  0x60   : > { %984 = shalt.err (!%p981_p3)
}
  0x61   : > { %s1530_s13 = smov 64   ;;  %283 = sbr.rel (%p1227_p8) target bundleno = 423 (0x1a7), region = 32 }
  0x62   : > { %817 = dma.hbm_to_vmem [thread:$0]  (!%p1328_p11), %s1324_s9, 128, %s1332_s25, %s1334_s12, %s1530_s13, %s1530_s13, %s1136_s29  }
  0x63   : > { %s1368_s30 = sand.u32 (!%p1227_p8), 1, %s1115_s19   ;;  %p1531_p4 = scmp.ne.s32.totalorder (!%p1227_p8), %s1523_s26, 0 }
  0x64   : > { %s730_s10 = sshll.u32 (!%p1227_p8), %s1368_s30, 3  ;;  %s286_s14 = scalar_lea.sflag (!%p1227_p8), [#allocation4], %s1368_s30 }
  0x65   : > { %s1374_s17 = scalar_lea.vmem (!%p1227_p8), [#allocation3], %s730_s10 }
  0x68   : > { %1094 = dma.done.wait (%p1531_p4), %s286_s14, 128  }
  0x69   : > { %1096 = vsyncadd (%p1531_p4), %s286_s14, 4294967168  ;;  %p1532_p9 = scmp.eq.s32.totalorder %s1206_s24, 0 }
  0x6b   : > { %1098 = dma.done.wait (%p1532_p9), [#allocation7], 1040   ;;  %p1533_p8 = pmov %p1532_p9 }
  0x6c   : > { %v1138_v0 = vmov 0.0   ;;  %vm1139_vm0 = vmmov 0   ;;  %v890_v1 = vld [vmem:[#allocation6] sm:$0xff]   ;;  %v891_v2 = vld [vmem:[#allocation6 + $0x8] sm:$0xff]   ;;  %v892_v3 = vld [vmem:[#allocation6 + $0x10] sm:$0xff]   ;;  %s756_s25 = sshll.u32 %s1123_s21, 7 }
  0x6d   : > { %1100 = vsyncadd (%p1533_p8), [#allocation7], 4294966256  ;;  %771 = vmatprep.subr.bf16.mxu0 %v1138_v0  ;;  %787 = vmatprep.mubr.msk.bf16.mxu0 %vm1139_vm0, %v1138_v0  ;;  %v893_v4 = vld [vmem:[#allocation6 + $0x18] sm:$0xff]   ;;  %v894_v5 = vld [vmem:[#allocation6 + $0x20] sm:$0xff]   ;;  %s319_s26 = scalar_lea.vmem [#allocation9], %s730_s10  ;;  %s1391_s12 = scalar_lea.hbm %s1515_s3, %s756_s25 }
  0x6e   : > { %772 = vmatpush3.bf16.msra.mxu0 %v890_v1  ;;  %v895_v6 = vld [vmem:[#allocation6 + $0x28] sm:$0xff]   ;;  %v896_v7 = vld [vmem:[#allocation6 + $0x30] sm:$0xff]   ;;  %v897_v8 = vld [vmem:[#allocation6 + $0x38] sm:$0xff]   ;;  %s524_s28 = sshll.u32 %s319_s26, 4  ;;  %s502_s8 = scalar_lea.sflag [#allocation5], %s1368_s30  ;;  %s1393_s28 = int_to_ptr.vmem [resolvable:$true] %s524_s28 }
  0x6f   : > { %773 = vmatprep.subr.bf16.mxu0 %v1138_v0  ;;  %v898_v9 = vld [vmem:[%s1374_s17] sm:$0xff]   ;;  %v734_v10 = vld [vmem:[#allocation8] ss:$0 sm:$0xff]  ;;  %s985_s15 = scalar_lea.vmem %s1393_s28, 128  ;;  %p1534_p1 = scmp.ne.s32.totalorder %s1528_s6, 0 }
  0x70   : > { %p986_p11 = scmp.ne.s32.totalorder %s1393_s28, %s985_s15  ;;  %s1140_s7 = smov [#allocation9]  }
  0x71   : > { %s989_s13 = sshll.u32 %s1140_s7, 4  ;;  %s990_s13 = int_to_ptr.vmem [resolvable:$false] %s989_s13 }
  0x72   : > { %774 = vmatpush3.bf16.msra.mxu0 %v891_v2  ;;  %p987_p13 = pnand %p986_p11, %p1534_p1  ;;  %s991_s10 = scalar_lea.vmem %s990_s13, 256 }
  0x73   : > { %775 = vmatprep.subr.bf16.mxu0 %v1138_v0  ;;  %p992_p7 = scmp.lt.s32.totalorder %s1393_s28, %s990_s13  ;;  %p993_p12 = scmp.lt.s32.totalorder %s991_s10, %s985_s15 }
  0x74   : > { %p988_p5 = pneg %p987_p13 }
  0x75   : > { %p994_p0 = por %p993_p12, %p992_p7 }
  0x76   : > { %776 = vmatpush3.bf16.msra.mxu0 %v892_v3 }
  0x77   : > { %777 = vmatprep.subr.bf16.mxu0 %v1138_v0  ;;  %p995_p2 = pnand %p994_p0, %p988_p5 }
  0x7a   : > { %778 = vmatpush3.bf16.msra.mxu0 %v893_v4 }
  0x7b   : > { %779 = vmatprep.subr.bf16.mxu0 %v1138_v0 }
  0x7e   : > { %780 = vmatpush3.bf16.msra.mxu0 %v894_v5 }
  0x7f   : > { %781 = vmatprep.subr.bf16.mxu0 %v1138_v0 }
  0x82   : > { %782 = vmatpush3.bf16.msra.mxu0 %v895_v6 }
  0x83   : > { %783 = vmatprep.subr.bf16.mxu0 %v1138_v0 }
  0x86   : > { %784 = vmatpush3.bf16.msra.mxu0 %v896_v7 }
  0x87   : > { %785 = vmatprep.subr.bf16.mxu0 %v1138_v0 }
  0x8a   : > { %786 = vmatpush3.bf16.msra.mxu0 %v897_v8 }
  0x8d   : > { %788 = vmatmul.mubr.bf16.vlgmr.msra.gmra.mrb[0].mxu0 %v898_v9 }
 0x160   : > { %v457_v11 = vpop.f32.mrb[0].mxu0 }
 0x161   : > { %v464_v12 = vadd.f32 %v734_v10, %v457_v11  ;;  %v789_v13 = vpop.f32.mrb[1].mxu0 }
 0x162   : > { %v460_v14 = vpop.f32.mrb[2].mxu0 }
 0x163   : > { %v465_v15 = vadd.f32 %v734_v10, %v460_v14  ;;  %v790_v16 = vpop.f32.mrb[3].mxu0  ;;  %v491_v17 = vmul.f32 %v464_v12, %v464_v12 }
 0x165   : > { %v760_v18 = vpack.c.bf16 %v465_v15, %v464_v12  ;;  %v483_v19 = vadd.f32 %v465_v15, %v464_v12  ;;  %v492_v20 = vmul.f32 %v465_v15, %v465_v15 }
 0x167   : > { %761 = vst [vmem:[%s319_s26] sm:$0xff] %v760_v18   ;;  %v484_v21 = vrot.slane %v483_v19, 4  ;;  %v493_v22 = vadd.f32 %v492_v20, %v491_v17 }
 0x168   : > { %998 = shalt.err (!%p995_p2)
}
 0x169   : > { %s999_s14 = scalar_lea.hbm %s1391_s12, 128  ;;  %s1003_s26 = scalar_lea.hbm %s1515_s3, 256 }
 0x16a   : > { %p1000_p6 = scmp.ne.s32.totalorder %s1391_s12, %s999_s14  ;;  %p1004_p4 = scmp.lt.u32.totalorder %s1391_s12, %s1515_s3 }
 0x16b   : > { %p1005_p9 = scmp.lt.u32.totalorder %s1003_s26, %s999_s14  ;;  %p1007_p11 = scmp.lt.u32.totalorder %s999_s14, %s1391_s12 }
 0x16c   : > { %p1001_p10 = pnand %p1000_p6, %p1534_p1 }
 0x16d   : > { %p1006_p8 = por %p1005_p9, %p1004_p4 }
 0x16e   : > { %p1002_p3 = pneg %p1001_p10 }
 0x16f   : > { %p1008_p13 = por %p1007_p11, %p1006_p8 }
 0x171   : > { %p1009_p5 = pnand %p1008_p13, %p1002_p3 }
 0x173   : > { %1012 = shalt.err (!%p1009_p5)
}
 0x174   : > { %s1141_s15 = smov 64   ;;  %s1142_s7 = smov 4   ;;  %v485_v23 = vadd.f32 %v484_v21, %v483_v19  ;;  %v494_v24 = vrot.slane %v493_v22, 4 }
 0x175   : > { %801 = dma.vmem_to_hbm [thread:$0]  (%p1534_p1), %s1393_s28, 128, %s1391_s12, %s502_s8, %s1141_s15, %s1141_s15, %s1142_s7  }
 0x176   : > { %v486_v25 = vrot.slane %v485_v23, 2  ;;  %v495_v26 = vadd.f32 %v494_v24, %v493_v22  ;;  %s506_s13 = sand.u32 1, %s1206_s24   ;;  %s749_s10 = sshll.u32 %s1123_s21, 4 }
 0x177   : > { %s325_s14 = scalar_lea.vmem [#allocation10], %s1368_s30  ;;  %s331_s25 = scalar_lea.vmem [#allocation12], %s1368_s30 }
 0x178   : > { %v487_v27 = vadd.f32 %v486_v25, %v485_v23  ;;  %v496_v28 = vrot.slane %v495_v26, 2  ;;  %s541_s17 = sshll.u32 %s325_s14, 4  ;;  %s555_s26 = sshll.u32 %s331_s25, 4  ;;  %s1430_s17 = int_to_ptr.vmem [resolvable:$true] %s541_s17  ;;  %s1437_s26 = int_to_ptr.vmem [resolvable:$true] %s555_s26 }
 0x179   : > { %s1428_s12 = scalar_lea.hbm %s1516_s4, %s749_s10  ;;  %s1435_s8 = scalar_lea.hbm %s1517_s5, %s749_s10 }
 0x17a   : > { %v488_v29 = vrot.slane %v487_v27, 1  ;;  %v497_v30 = vadd.f32 %v496_v28, %v495_v26  ;;  %s1439_s9 = scalar_lea.sflag [#allocation11], %s506_s13  ;;  %s1013_s15 = scalar_lea.vmem %s1430_s17, 16 }
 0x17b   : > { %p1014_p7 = scmp.ne.s32.totalorder %s1430_s17, %s1013_s15  ;;  %s1143_s7 = smov [#allocation10]  }
 0x17c   : > { %v498_v31 = vrot.slane %v497_v30, 1  ;;  %v489_v32 = vadd.f32 %v488_v29, %v487_v27  ;;  %s1017_s29 = sshll.u32 %s1143_s7, 4  ;;  %s1018_s29 = int_to_ptr.vmem [resolvable:$false] %s1017_s29 }
 0x17d   : > { %p1015_p12 = pnand %p1014_p7, %p1534_p1  ;;  %s1019_s28 = scalar_lea.vmem %s1018_s29, 32 }
 0x17e   : > { %490 = vst [vmem:[%s325_s14] sm:$0x1] %v489_v32  ;;  %v499_v33 = vadd.f32 %v498_v31, %v497_v30  ;;  %p1020_p2 = scmp.lt.s32.totalorder %s1430_s17, %s1018_s29  ;;  %p1021_p6 = scmp.lt.s32.totalorder %s1019_s28, %s1013_s15 }
 0x17f   : > { %p1016_p0 = pneg %p1015_p12 }
 0x180   : > { %p1022_p10 = por %p1021_p6, %p1020_p2 }
 0x182   : > { %p1023_p3 = pnand %p1022_p10, %p1016_p0 }
 0x184   : > { %1026 = shalt.err (!%p1023_p3)
}
 0x185   : > { %s1027_s13 = scalar_lea.hbm %s1428_s12, 16  ;;  %s1031_s21 = scalar_lea.hbm %s1516_s4, 32 }
 0x186   : > { %p1028_p4 = scmp.ne.s32.totalorder %s1428_s12, %s1027_s13  ;;  %p1032_p11 = scmp.lt.u32.totalorder %s1428_s12, %s1516_s4 }
 0x187   : > { %p1033_p13 = scmp.lt.u32.totalorder %s1031_s21, %s1027_s13  ;;  %p1035_p7 = scmp.lt.u32.totalorder %s1027_s13, %s1428_s12 }
 0x188   : > { %p1029_p9 = pnand %p1028_p4, %p1534_p1 }
 0x189   : > { %p1034_p5 = por %p1033_p13, %p1032_p11 }
 0x18a   : > { %p1030_p8 = pneg %p1029_p9 }
 0x18b   : > { %p1036_p12 = por %p1035_p7, %p1034_p5 }
 0x18d   : > { %p1037_p0 = pnand %p1036_p12, %p1030_p8 }
 0x18f   : > { %1040 = shalt.err (!%p1037_p0)
}
 0x190   : > { %802 = dma.vmem_to_hbm [thread:$0]  (%p1534_p1), %s1430_s17, 16, %s1428_s12, %s1439_s9   ;;  %500 = vst [vmem:[%s331_s25] sm:$0x1] %v499_v33 }
 0x191   : > { %s1041_s15 = scalar_lea.vmem %s1437_s26, 16  ;;  %s1144_s29 = smov [#allocation12]  }
 0x192   : > { %p1042_p2 = scmp.ne.s32.totalorder %s1437_s26, %s1041_s15  ;;  %s1045_s28 = sshll.u32 %s1144_s29, 4  ;;  %s1046_s28 = int_to_ptr.vmem [resolvable:$false] %s1045_s28 }
 0x193   : > { %s1047_s13 = scalar_lea.vmem %s1046_s28, 32  ;;  %p1048_p3 = scmp.lt.s32.totalorder %s1437_s26, %s1046_s28 }
 0x194   : > { %p1043_p6 = pnand %p1042_p2, %p1534_p1  ;;  %p1049_p4 = scmp.lt.s32.totalorder %s1047_s13, %s1041_s15 }
 0x196   : > { %p1044_p10 = pneg %p1043_p6  ;;  %p1050_p9 = por %p1049_p4, %p1048_p3 }
 0x198   : > { %p1051_p8 = pnand %p1050_p9, %p1044_p10 }
 0x19a   : > { %1054 = shalt.err (!%p1051_p8)
}
 0x19b   : > { %s1055_s30 = scalar_lea.hbm %s1435_s8, 16  ;;  %s1059_s12 = scalar_lea.hbm %s1517_s5, 32 }
 0x19c   : > { %p1056_p11 = scmp.ne.s32.totalorder %s1435_s8, %s1055_s30  ;;  %p1060_p7 = scmp.lt.u32.totalorder %s1435_s8, %s1517_s5 }
 0x19d   : > { %p1061_p12 = scmp.lt.u32.totalorder %s1059_s12, %s1055_s30  ;;  %p1063_p2 = scmp.lt.u32.totalorder %s1055_s30, %s1435_s8 }
 0x19e   : > { %p1057_p13 = pnand %p1056_p11, %p1534_p1 }
 0x19f   : > { %p1062_p0 = por %p1061_p12, %p1060_p7 }
 0x1a0   : > { %p1058_p5 = pneg %p1057_p13 }
 0x1a1   : > { %p1064_p6 = por %p1063_p2, %p1062_p0 }
 0x1a3   : > { %p1065_p10 = pnand %p1064_p6, %p1058_p5 }
 0x1a5   : > { %1068 = shalt.err (!%p1065_p10)
}
 0x1a6   : > { %803 = dma.vmem_to_hbm [thread:$0]  (%p1534_p1), %s1437_s26, 16, %s1435_s8, %s1439_s9  }
 0x1a7 PF: > { %s567_s21 = sand.u32 1, %s1111_s18   ;;  %p1535_p3 = scmp.ne.s32.totalorder %s1524_s27, 0 }
 0x1a8   : > { %p1536_p4 = scmp.ge.s32.totalorder %s1131_s23, 2  ;;  %s568_s24 = scalar_lea.sflag [#allocation5], %s567_s21 }
 0x1aa   : > { %p819_p9 = pnand %p1536_p4, %p1535_p3 }
 0x1ac   : > { %1102 = dma.done.wait (!%p819_p9), %s568_s24, 128  }
 0x1ad   : > { %1104 = vsyncadd (!%p819_p9), %s568_s24, 4294967168  ;;  %s1537_s7 = sadd.s32 4294967294, %s1131_s23  }
 0x1ae   : > { %s576_s15 = sand.u32 1, %s1537_s7  }
 0x1af   : > { %s577_s29 = scalar_lea.sflag [#allocation11], %s576_s15 }
 0x1b0   : > { %1106 = dma.done.wait (!%p819_p9), %s577_s29, 32  }
 0x1b1   : > { %1108 = vsyncadd (!%p819_p9), %s577_s29, 4294967264  ;;  %s26_s23 = sadd.s32 1, %s1131_s23   ;;  %s1538_s18 = smov %s1115_s19 }
 0x1b2   : > { %p23_p1 = scmp.ge.s32.totalorder %s26_s23, 4   ;;  %s1539_s19 = smov %s1119_s20 }
 0x1b3   : > { %s1540_s20 = smov %s1319_s16  ;;  %s1541_s21 = smov %s1127_s22 }
 0x1b4   : > { %s1542_s22 = smov %s1544_s11  ;;  %25 = sbr.rel (!%p23_p1) target bundleno = 9 (0x9), region = 127 }
 0x1bb   :  { %589 = vsyncpa [#allocation4], 1 }
 0x1bc   :  { %591 = vsyncpa [#allocation4 + $0x1], 1 }
 0x1bd   :  { %592 = vsyncpa [#allocation7], 1 }
 0x1be   :  { %593 = vsyncpa [#allocation5], 1 }
 0x1bf   :  { %595 = vsyncpa [#allocation5 + $0x1], 1 }
 0x1c0   :  { %596 = vsyncpa [#allocation11], 1 }
 0x1c1   :  { %598 = vsyncpa [#allocation11 + $0x1], 1 }

// kernel: disblock_forward.6
= control target key start
LH: loop header
LB: loop body
LE: loop exit
PB: predicated region body
PF: predicated region fallthrough
CT: control target
= control target key end

     0   :  { %8 = vsyncpa [#allocation3], 0  ;;  %s349_s0 = inlined_call_operand.hbm [shape: bf16[32,128], index: 0, kind: input, shape index: {}]   ;;  %s350_s1 = inlined_call_operand.hbm [shape: f32[1,128], index: 1, kind: input, shape index: {}]   ;;  %s351_s2 = inlined_call_operand.hbm [shape: f32[1,128], index: 2, kind: input, shape index: {}]   ;;  %s352_s3 = inlined_call_operand.hbm [shape: bf16[32,128], index: 3, kind: output, shape index: {}]  }
   0x1   :  { %9 = vsyncpa [#allocation6], 0 }
   0x2   :  { %10 = vsyncpa [#allocation4], 0  ;;  %s262_s12 = smov [#allocation5]   ;;  %s263_s14 = smov [#allocation2]  }
   0x3   :  { %s29_s13 = sshll.u32 %s262_s12, 4  ;;  %s16_s15 = sshll.u32 %s263_s14, 4  ;;  %s30_s13 = int_to_ptr.vmem [resolvable:$true] %s29_s13  ;;  %s288_s15 = int_to_ptr.vmem [resolvable:$true] %s16_s15 }
   0x4   :  { %s168_s18 = scalar_lea.hbm %s350_s1, 16 }
   0x5   :  { %p169_p0 = scmp.ne.s32.totalorder %s350_s1, %s168_s18  ;;  %p172_p1 = scmp.lt.u32.totalorder %s168_s18, %s350_s1 }
   0x7   :  { %p174_p2 = pnand %p172_p1, %p169_p0 }
   0x9   :  { %177 = shalt.err (!%p174_p2)
}
   0xa   :  { %s178_s23 = scalar_lea.vmem %s30_s13, 16  ;;  %s182_s24 = scalar_lea.vmem %s30_s13, 32 }
   0xb   :  { %p179_p3 = scmp.ne.s32.totalorder %s30_s13, %s178_s23  ;;  %p183_p4 = scmp.lt.s32.totalorder %s30_s13, %s30_s13 }
   0xc   :  { %p184_p5 = scmp.lt.s32.totalorder %s182_s24, %s178_s23 }
   0xe   :  { %p185_p6 = por %p184_p5, %p183_p4 }
  0x10   :  { %p186_p7 = pnand %p185_p6, %p179_p3 }
  0x12   :  { %189 = shalt.err (!%p186_p7)
}
  0x13   :  { %32 = dma.hbm_to_vmem [thread:$0]  %s350_s1, 16, %s30_s13, [#allocation6]  }
  0x14   :  { %s190_s29 = scalar_lea.hbm %s349_s0, 256 }
  0x15   :  { %p191_p8 = scmp.ne.s32.totalorder %s349_s0, %s190_s29  ;;  %p194_p9 = scmp.lt.u32.totalorder %s190_s29, %s349_s0 }
  0x17   :  { %p196_p10 = pnand %p194_p9, %p191_p8 }
  0x19   :  { %199 = shalt.err (!%p196_p10)
}
  0x1a   :  { %s200_s7 = scalar_lea.vmem %s288_s15, 256  ;;  %p205_p12 = scmp.lt.s32.totalorder %s288_s15, %s288_s15 }
  0x1b   :  { %p201_p11 = scmp.ne.s32.totalorder %s288_s15, %s200_s7  ;;  %p206_p13 = scmp.lt.s32.totalorder %s200_s7, %s200_s7 }
  0x1d   :  { %p207_p0 = por %p206_p13, %p205_p12 }
  0x1f   :  { %p208_p1 = pnand %p207_p0, %p201_p11 }
  0x21   :  { %211 = shalt.err (!%p208_p1)
}
  0x22   :  { %s264_s1 = smov 64   ;;  %s265_s8 = smov 4  }
  0x23   :  { %22 = dma.hbm_to_vmem [thread:$0]  %s349_s0, 256, %s288_s15, [#allocation3], %s264_s1, %s264_s1, %s265_s8  }
  0x24   :  { %s266_s11 = smov [#allocation7]   ;;  %s212_s16 = scalar_lea.hbm %s351_s2, 16 }
  0x25   :  { %s39_s12 = sshll.u32 %s266_s11, 4  ;;  %p213_p2 = scmp.ne.s32.totalorder %s351_s2, %s212_s16  ;;  %s40_s12 = int_to_ptr.vmem [resolvable:$true] %s39_s12 }
  0x26   :  { %p216_p3 = scmp.lt.u32.totalorder %s212_s16, %s351_s2 }
  0x28   :  { %p218_p4 = pnand %p216_p3, %p213_p2 }
  0x2a   :  { %221 = shalt.err (!%p218_p4)
}
  0x2b   :  { %s222_s21 = scalar_lea.vmem %s40_s12, 16  ;;  %s226_s0 = scalar_lea.vmem %s40_s12, 32 }
  0x2c   :  { %p223_p5 = scmp.ne.s32.totalorder %s40_s12, %s222_s21  ;;  %p227_p6 = scmp.lt.s32.totalorder %s40_s12, %s40_s12 }
  0x2d   :  { %p228_p7 = scmp.lt.s32.totalorder %s226_s0, %s222_s21 }
  0x2f   :  { %p229_p8 = por %p228_p7, %p227_p6 }
  0x31   :  { %p230_p9 = pnand %p229_p8, %p223_p5 }
  0x33   :  { %233 = shalt.err (!%p230_p9)
}
  0x34   :  { %42 = dma.hbm_to_vmem [thread:$0]  %s351_s2, 16, %s40_s12, [#allocation6]  }
  0x35   :  { %256 = dma.done.wait [#allocation3], 256  }
  0x36   :  { %257 = vsyncadd [#allocation3], 4294967040 }
  0x37   :  { %258 = dma.done.wait [#allocation6], 32  }
  0x38   :  { %259 = vsyncadd [#allocation6], 4294967264  ;;  %v143_v0 = vld [vmem:[#allocation2] sm:$0xff]   ;;  %v132_v1 = vld [vmem:[#allocation5] ss:$0 sm:$0xff]  ;;  %s267_s2 = smov [#allocation8]  }
  0x39   :  { %v144_v2 = vunpack.c.l.bf16 %v143_v0  ;;  %v145_v3 = vunpack.c.h.bf16 %v143_v0  ;;  %v160_v4 = vld [vmem:[#allocation2 + $0x8] sm:$0xff]   ;;  %v133_v5 = vld [vmem:[#allocation7] ss:$0 sm:$0xff]  ;;  %s119_s23 = sshll.u32 %s267_s2, 4  ;;  %s120_s23 = int_to_ptr.vmem [resolvable:$true] %s119_s23 }
  0x3a   :  { %v148_v6 = vunpack.c.l.bf16 %v160_v4  ;;  %v149_v7 = vunpack.c.h.bf16 %v160_v4  ;;  %s234_s24 = scalar_lea.vmem %s120_s23, 256  ;;  %p239_p11 = scmp.lt.s32.totalorder %s120_s23, %s120_s23 }
  0x3b   :  { %v67_v8 = vmul.f32 %v144_v2, %v132_v1  ;;  %v68_v9 = vmul.f32 %v145_v3, %v132_v1  ;;  %p235_p10 = scmp.ne.s32.totalorder %s120_s23, %s234_s24  ;;  %p240_p12 = scmp.lt.s32.totalorder %s234_s24, %s234_s24 }
  0x3c   :  { %v69_v10 = vmul.f32 %v148_v6, %v132_v1  ;;  %v70_v11 = vmul.f32 %v149_v7, %v132_v1 }
  0x3d   :  { %v78_v12 = vadd.f32 %v133_v5, %v67_v8  ;;  %v79_v13 = vadd.f32 %v133_v5, %v68_v9  ;;  %p241_p13 = por %p240_p12, %p239_p11 }
  0x3e   :  { %v80_v14 = vadd.f32 %v133_v5, %v69_v10  ;;  %v81_v15 = vadd.f32 %v133_v5, %v70_v11 }
  0x3f   :  { %vm82_vm0 = vcmp.ge.f32.partialorder %v78_v12, 0.0  ;;  %vm83_vm1 = vcmp.ge.f32.partialorder %v79_v13, 0.0  ;;  %v86_v16 = vmul.f32 0.2, %v78_v12  ;;  %v87_v17 = vmul.f32 0.2, %v79_v13  ;;  %p242_p0 = pnand %p241_p13, %p235_p10 }
  0x40   :  { %vm84_vm2 = vcmp.ge.f32.partialorder %v80_v14, 0.0  ;;  %vm85_vm3 = vcmp.ge.f32.partialorder %v81_v15, 0.0  ;;  %v88_v18 = vmul.f32 0.2, %v80_v14  ;;  %v89_v19 = vmul.f32 0.2, %v81_v15 }
  0x41   :  { %v90_v20 = vsel %vm82_vm0, %v78_v12, %v86_v16  ;;  %v91_v21 = vsel %vm83_vm1, %v79_v13, %v87_v17 }
  0x42   :  { %v153_v22 = vpack.c.bf16 %v91_v21, %v90_v20  ;;  %v92_v23 = vsel %vm84_vm2, %v80_v14, %v88_v18  ;;  %v93_v24 = vsel %vm85_vm3, %v81_v15, %v89_v19 }
  0x43   :  { %v158_v25 = vpack.c.bf16 %v93_v24, %v92_v23 }
  0x44   :  { %154 = vst [vmem:[#allocation8] sm:$0xff] %v153_v22  }
  0x45   :  { %161 = vst [vmem:[#allocation8 + $0x8] sm:$0xff] %v158_v25  }
  0x46   :  { %245 = shalt.err (!%p242_p0)
}
  0x47   :  { %s246_s27 = scalar_lea.hbm %s352_s3, 256 }
  0x48   :  { %p247_p1 = scmp.ne.s32.totalorder %s352_s3, %s246_s27  ;;  %p250_p2 = scmp.lt.u32.totalorder %s246_s27, %s352_s3 }
  0x4a   :  { %p252_p3 = pnand %p250_p2, %p247_p1 }
  0x4c   :  { %255 = shalt.err (!%p252_p3)
}
  0x4d   :  { %125 = dma.vmem_to_hbm [thread:$0]  %s120_s23, 256, %s352_s3, [#allocation4], %s264_s1, %s264_s1, %s265_s8  }
  0x4e   :  { %260 = dma.done.wait [#allocation4], 256  }
  0x4f   :  { %261 = vsyncadd [#allocation4], 4294967040 }
  0x50   :  { %129 = vsyncpa [#allocation3], 1 }
  0x51   :  { %130 = vsyncpa [#allocation6], 1 }
  0x52   :  { %131 = vsyncpa [#allocation4], 1 }

// kernel: disblock_forward.7
= control target key start
LH: loop header
LB: loop body
LE: loop exit
PB: predicated region body
PF: predicated region fallthrough
CT: control target
= control target key end

     0   :  { %8 = vsyncpa [#allocation4], 0  ;;  %s1155_s0 = inlined_call_operand.hbm [shape: bf16[32,144], index: 0, kind: input, shape index: {}]   ;;  %s1156_s1 = inlined_call_operand.hbm [shape: bf16[144,128], index: 1, kind: input, shape index: {}]   ;;  %s1157_s2 = inlined_call_operand.hbm [shape: f32[1,128], index: 2, kind: input, shape index: {}]   ;;  %s1158_s3 = inlined_call_operand.hbm [shape: f32[32,128], index: 3, kind: output, shape index: {}]  }
   0x1   :  { %10 = vsyncpa [#allocation4 + $0x1], 0 }
   0x2   :  { %11 = vsyncpa [#allocation7], 0 }
   0x3   :  { %12 = vsyncpa [#allocation5], 0 }
   0x4   :  { %14 = vsyncpa [#allocation5 + $0x1], 0  ;;  %s891_s12 = smov 0   ;;  %s893_s13 = smov 0  }
   0x5   :  { %s895_s14 = smov 0   ;;  %s897_s15 = smov 0  }
   0x6   :  { %s899_s16 = smov 0   ;;  %s901_s17 = smov 0  }
   0x7 LB: > { %s548_s18 = sadd.s32 4294967295, %s858_s17   ;;  %s549_s19 = sadd.s32 4294967294, %s858_s17   ;;  %s858_s17 = sphi %s901_s17, %s20_s17   ;;  %s854_s16 = sphi %s899_s16, %s1180_s16   ;;  %s850_s15 = sphi %s897_s15, %s1179_s15   ;;  %s846_s14 = sphi %s895_s14, %s1178_s14   ;;  %s842_s13 = sphi %s893_s13, %s1177_s13   ;;  %s838_s12 = sphi %s891_s12, %s1176_s12  }
   0x8   : > { %p61_p0 = scmp.ne.s32.totalorder %s842_s13, %s838_s12  ;;  %p925_p1 = scmp.eq.s32.totalorder %s548_s18, 0 }
   0x9   : > { %p929_p2 = scmp.eq.s32.totalorder %s548_s18, 1  ;;  %p147_p3 = scmp.eq.s32.totalorder %s549_s19, 1 }
   0xa   : > { %s1163_s20 = scalar_select %p925_p1, 1, 0 }
   0xb   : > { %p935_p4 = por %p925_p1, %p61_p0  ;;  %p550_p5 = scmp.ge.s32.totalorder %s858_s17, 1 }
   0xc   : > { %p940_p6 = por %p147_p3, %p61_p0  ;;  %p154_p7 = scmp.lt.s32.totalorder %s858_s17, 3 }
   0xd   : > { %s1165_s22 = scalar_select %p935_p4, 1, 0 }
   0xe   : > { %s1166_s23 = scalar_select %p940_p6, 1, 0 }
   0xf   : > { %p945_p8 = pnand %p550_p5, %p154_p7  ;;  %s860_s25 = smov [#allocation6]  }
  0x10   : > { %s170_s26 = sshll.u32 %s860_s25, 4  ;;  %s861_s28 = smov [#allocation8]   ;;  %s949_s26 = int_to_ptr.vmem [resolvable:$true] %s170_s26 }
  0x11   : > { %p596_p9 = pneg %p945_p8  ;;  %s186_s29 = sshll.u32 %s861_s28, 4  ;;  %s960_s29 = int_to_ptr.vmem [resolvable:$true] %s186_s29 }
  0x12   : > { %s686_s5 = scalar_lea.hbm %s1156_s1, 1152 }
  0x13   : > { %p956_p11 = pnand %p596_p9, %p925_p1  ;;  %p687_p12 = scmp.ne.s32.totalorder %s1156_s1, %s686_s5 }
  0x14   : > { %p693_p5 = scmp.lt.u32.totalorder %s686_s5, %s1156_s1 }
  0x15   : > { %p688_p13 = pneg %p956_p11 }
  0x17   : > { %p689_p0 = pnand %p688_p13, %p687_p12 }
  0x19   : > { %p690_p3 = pneg %p689_p0 }
  0x1b   : > { %p695_p7 = pnand %p693_p5, %p690_p3 }
  0x1d   : > { %698 = shalt.err (!%p695_p7)
}
  0x1e   : > { %s699_s10 = scalar_lea.vmem %s949_s26, 1152  ;;  %p707_p1 = scmp.lt.s32.totalorder %s949_s26, %s949_s26 }
  0x1f   : > { %p700_p9 = scmp.ne.s32.totalorder %s949_s26, %s699_s10  ;;  %p708_p12 = scmp.lt.s32.totalorder %s699_s10, %s699_s10 }
  0x21   : > { %p702_p10 = pnand %p700_p9, %p688_p13  ;;  %p709_p0 = por %p708_p12, %p707_p1 }
  0x23   : > { %p703_p6 = pneg %p702_p10 }
  0x25   : > { %p710_p4 = pnand %p709_p0, %p703_p6 }
  0x27   : > { %713 = shalt.err (!%p710_p4)
}
  0x28   : > { %s862_s11 = smov 64   ;;  %s863_s18 = smov 4  }
  0x29   : > { %599 = dma.hbm_to_vmem [thread:$0]  (!%p956_p11), %s1156_s1, 1152, %s949_s26, [#allocation7], %s862_s11, %s862_s11, %s863_s18  }
  0x2a   : > { %s714_s4 = scalar_lea.hbm %s1157_s2, 16 }
  0x2b   : > { %p715_p1 = scmp.ne.s32.totalorder %s1157_s2, %s714_s4  ;;  %p721_p10 = scmp.lt.u32.totalorder %s714_s4, %s1157_s2 }
  0x2d   : > { %p717_p4 = pnand %p715_p1, %p688_p13 }
  0x2f   : > { %p718_p6 = pneg %p717_p4 }
  0x31   : > { %p723_p3 = pnand %p721_p10, %p718_p6 }
  0x33   : > { %726 = shalt.err (!%p723_p3)
}
  0x34   : > { %s727_s26 = scalar_lea.vmem %s960_s29, 16  ;;  %s734_s9 = scalar_lea.vmem %s960_s29, 32 }
  0x35   : > { %p728_p5 = scmp.ne.s32.totalorder %s960_s29, %s727_s26  ;;  %p735_p12 = scmp.lt.s32.totalorder %s960_s29, %s960_s29 }
  0x36   : > { %p736_p0 = scmp.lt.s32.totalorder %s734_s9, %s727_s26 }
  0x37   : > { %p730_p7 = pnand %p728_p5, %p688_p13 }
  0x38   : > { %p737_p1 = por %p736_p0, %p735_p12 }
  0x39   : > { %p731_p9 = pneg %p730_p7 }
  0x3b   : > { %p738_p4 = pnand %p737_p1, %p731_p9 }
  0x3d   : > { %741 = shalt.err (!%p738_p4)
}
  0x3e   : > { %602 = dma.hbm_to_vmem [thread:$0]  (!%p956_p11), %s1157_s2, 16, %s960_s29, [#allocation7]  }
  0x3f   : > { %s39_s18 = sadd.s32 1, %s854_s16  ;;  %s48_s19 = sadd.s32 1, %s846_s14 }
  0x40   : > { %p41_p13 = scmp.ge.s32.totalorder %s39_s18, 2  ;;  %p55_p6 = scmp.ne.s32.totalorder %s846_s14, %s842_s13 }
  0x41   : > { %p56_p10 = scmp.eq.s32.totalorder %s858_s17, 0  ;;  %p613_p3 = scmp.lt.s32.totalorder %s858_s17, 2 }
  0x42   : > { %s1182_s18 = smov (%p41_p13, %s39_s18), 0  ;;  %p1025_p7 = por %p929_p2, %p55_p6 }
  0x43   : > { %p57_p5 = por %p56_p10, %p55_p6  ;;  %s43_s25 = ssub.s32 %s854_s16, %s1182_s18 }
  0x44   : > { %s1169_s27 = scalar_select %p1025_p7, 1, 0 }
  0x45   : > { %s197_s28 = sand.u32 1, %s846_s14   ;;  %p46_p9 = scmp.eq.s32.totalorder %s43_s25, 0 }
  0x46   : > { %s554_s29 = sshll.u32 %s197_s28, 4  ;;  %s582_s30 = sshll.u32 %s854_s16, 8 }
  0x47   : > { %s1034_s4 = scalar_select %p46_p9, %s846_s14, %s48_s19  }
  0x48   : > { %s1039_s7 = scalar_lea.hbm %s1155_s0, %s582_s30  ;;  %s201_s21 = scalar_lea.vmem [#allocation3], %s554_s29 }
  0x49   : > { %s211_s8 = sshll.u32 %s201_s21, 4  ;;  %p1043_p2 = pnand %p613_p3, %p57_p5  ;;  %s1047_s8 = int_to_ptr.vmem [resolvable:$true] %s211_s8 }
  0x4a   : > { %s1049_s9 = scalar_lea.sflag [#allocation4], %s197_s28  ;;  %s742_s10 = scalar_lea.hbm %s1039_s7, 256 }
  0x4b   : > { %p743_p11 = scmp.ne.s32.totalorder %s1039_s7, %s742_s10  ;;  %p744_p12 = pneg %p1043_p2 }
  0x4c   : > { %s747_s25 = scalar_lea.hbm %s1155_s0, 512  ;;  %p748_p4 = scmp.lt.u32.totalorder %s1039_s7, %s1155_s0 }
  0x4d   : > { %p745_p0 = pnand %p744_p12, %p743_p11  ;;  %p749_p13 = scmp.lt.u32.totalorder %s747_s25, %s742_s10 }
  0x4e   : > { %p751_p10 = scmp.lt.u32.totalorder %s742_s10, %s1039_s7 }
  0x4f   : > { %p746_p1 = pneg %p745_p0  ;;  %p750_p6 = por %p749_p13, %p748_p4 }
  0x51   : > { %p752_p3 = por %p751_p10, %p750_p6 }
  0x53   : > { %p753_p5 = pnand %p752_p3, %p746_p1 }
  0x55   : > { %756 = shalt.err (!%p753_p5)
}
  0x56   : > { %s757_s28 = scalar_lea.vmem %s1047_s8, 256  ;;  %s864_s5 = smov [#allocation3]  }
  0x57   : > { %p758_p9 = scmp.ne.s32.totalorder %s1047_s8, %s757_s28  ;;  %s762_s6 = sshll.u32 %s864_s5, 4  ;;  %s763_s6 = int_to_ptr.vmem [resolvable:$false] %s762_s6 }
  0x58   : > { %s764_s21 = scalar_lea.vmem %s763_s6, 512  ;;  %p765_p7 = scmp.lt.s32.totalorder %s1047_s8, %s763_s6 }
  0x59   : > { %p760_p11 = pnand %p758_p9, %p744_p12  ;;  %p766_p4 = scmp.lt.s32.totalorder %s764_s21, %s757_s28 }
  0x5b   : > { %p761_p0 = pneg %p760_p11  ;;  %p767_p13 = por %p766_p4, %p765_p7 }
  0x5d   : > { %p768_p6 = pnand %p767_p13, %p761_p0 }
  0x5f   : > { %771 = shalt.err (!%p768_p6)
}
  0x60   : > { %s865_s10 = smov 128   ;;  %s866_s11 = smov 8  }
  0x61   : > { %606 = dma.hbm_to_vmem [thread:$0]  (!%p1043_p2), %s1039_s7, 256, %s1047_s8, %s1049_s9, %s865_s10, %s865_s10, %s866_s11  }
  0x62   : > { %223 = sbr.rel (%p945_p8) target bundleno = 377 (0x179), region = 32  ;;  %s1080_s19 = sand.u32 (!%p945_p8), 1, %s842_s13  }
  0x63   : > { %s559_s25 = sshll.u32 (!%p945_p8), %s1080_s19, 4  ;;  %s226_s29 = scalar_lea.sflag (!%p945_p8), [#allocation4], %s1080_s19 }
  0x64   : > { %s1086_s30 = scalar_lea.vmem (!%p945_p8), [#allocation3], %s559_s25  ;;  %p1171_p7 = scmp.ne.s32.totalorder (!%p945_p8), %s1165_s22, 0 }
  0x69   : > { %825 = dma.done.wait (%p1171_p7), %s226_s29, 256  }
  0x6a   : > { %827 = vsyncadd (%p1171_p7), %s226_s29, 4294967040  ;;  %p1172_p2 = scmp.ne.s32.totalorder %s1163_s20, 0 }
  0x6c   : > { %829 = dma.done.wait (%p1172_p2), [#allocation7], 1168  }
  0x6d   : > { %831 = vsyncadd (%p1172_p2), [#allocation7], 4294966128  ;;  %v867_v0 = vmov 0   ;;  %v674_v1 = vld [vmem:[#allocation6] sm:$0xff]   ;;  %v675_v2 = vld [vmem:[#allocation6 + $0x8] sm:$0xff]   ;;  %vm363_vm0 = vcmask 130048  }
  0x6e   : > { %367 = vmatprep.subr.bf16.mxu0 %v867_v0  ;;  %v676_v3 = vld [vmem:[#allocation6 + $0x10] sm:$0xff]   ;;  %v677_v4 = vld [vmem:[#allocation6 + $0x18] sm:$0xff]   ;;  %v678_v6 = vld [vmem:[#allocation6 + $0x20] sm:$0xff]   ;;  %s259_s20 = scalar_lea.vmem [#allocation9], %s559_s25  ;;  %s583_s24 = sshll.u32 %s850_s15, 8 }
  0x6f   : > { %368 = vmatpush1.bf16.msra.mxu0 %v674_v1  ;;  %v685_v5 = vld [vmem:[%s1086_s30 + $0x4] ss:$8 sps:$4 sm:$0xff]   ;;  %v683_v11 = vld [vmem:[%s1086_s30] ss:$8 sps:$4 sm:$0xff]   ;;  %s434_s22 = sshll.u32 %s259_s20, 4  ;;  %s1106_s26 = scalar_lea.hbm %s1158_s3, %s583_s24  ;;  %s1101_s22 = int_to_ptr.vmem [resolvable:$true] %s434_s22 }
  0x70   : > { %369 = vmatprep.subr.bf16.mxu0 %v867_v0  ;;  %575 = vmatprep.mubr.msk.bf16.mxu0 %vm363_vm0, %v685_v5  ;;  %v679_v7 = vld [vmem:[#allocation6 + $0x28] sm:$0xff]   ;;  %v680_v8 = vld [vmem:[#allocation6 + $0x30] sm:$0xff]   ;;  %v681_v9 = vld [vmem:[#allocation6 + $0x38] sm:$0xff]   ;;  %s420_s9 = scalar_lea.sflag [#allocation5], %s1080_s19  ;;  %s772_s15 = scalar_lea.vmem %s1101_s22, 256 }
  0x71   : > { %v682_v10 = vld [vmem:[#allocation6 + $0x40] sm:$0xff]   ;;  %v563_v12 = vld [vmem:[#allocation8] ss:$0 sm:$0xff]  ;;  %p773_p8 = scmp.ne.s32.totalorder %s1101_s22, %s772_s15  ;;  %p1173_p12 = scmp.ne.s32.totalorder %s1169_s27, 0 }
  0x72   : > { %s868_s28 = smov [#allocation9]  }
  0x73   : > { %370 = vmatpush1.bf16.msra.mxu0 %v675_v2  ;;  %p774_p1 = pnand %p773_p8, %p1173_p12  ;;  %s776_s5 = sshll.u32 %s868_s28, 4  ;;  %s777_s5 = int_to_ptr.vmem [resolvable:$false] %s776_s5 }
  0x74   : > { %371 = vmatprep.subr.bf16.mxu0 %v867_v0  ;;  %s778_s6 = scalar_lea.vmem %s777_s5, 512  ;;  %p779_p3 = scmp.lt.s32.totalorder %s1101_s22, %s777_s5 }
  0x75   : > { %p775_p10 = pneg %p774_p1  ;;  %p780_p5 = scmp.lt.s32.totalorder %s778_s6, %s772_s15 }
  0x77   : > { %372 = vmatpush1.bf16.msra.mxu0 %v676_v3  ;;  %p781_p9 = por %p780_p5, %p779_p3 }
  0x78   : > { %373 = vmatprep.subr.bf16.mxu0 %v867_v0 }
  0x79   : > { %p782_p11 = pnand %p781_p9, %p775_p10 }
  0x7b   : > { %374 = vmatpush1.bf16.msra.mxu0 %v677_v4 }
  0x7c   : > { %375 = vmatprep.subr.bf16.mxu0 %v867_v0 }
  0x7f   : > { %376 = vmatpush1.bf16.msra.mxu0 %v678_v6 }
  0x80   : > { %377 = vmatprep.subr.bf16.mxu0 %v867_v0 }
  0x83   : > { %378 = vmatpush1.bf16.msra.mxu0 %v679_v7 }
  0x84   : > { %379 = vmatprep.subr.bf16.mxu0 %v867_v0 }
  0x87   : > { %380 = vmatpush1.bf16.msra.mxu0 %v680_v8 }
  0x88   : > { %381 = vmatprep.subr.bf16.mxu0 %v867_v0 }
  0x8b   : > { %382 = vmatpush1.bf16.msra.mxu0 %v681_v9 }
  0x8c   : > { %383 = vmatprep.subr.bf16.mxu0 %v867_v0 }
  0x8f   : > { %384 = vmatpush1.bf16.msra.mxu0 %v682_v10 }
  0x92   : > { %400 = vmatmul.mubr.bf16.vlgmr.msra.gmra.mrb[0].mxu0 %v683_v11 }
 0x165   : > { %v401_v13 = vpop.f32.mrb[0].mxu0 }
 0x166   : > { %v408_v14 = vadd.f32 %v563_v12, %v401_v13  ;;  %v403_v15 = vpop.f32.mrb[1].mxu0 }
 0x167   : > { %v404_v16 = vpop.f32.mrb[2].mxu0 }
 0x168   : > { %417 = vst [vmem:[%s259_s20] sm:$0xff] %v408_v14  ;;  %v409_v17 = vadd.f32 %v563_v12, %v404_v16  ;;  %v406_v18 = vpop.f32.mrb[3].mxu0 }
 0x16a   : > { %418 = vst [vmem:[%s259_s20 + $0x8] sm:$0xff] %v409_v17 }
 0x16b   : > { %785 = shalt.err (!%p782_p11)
}
 0x16c   : > { %s786_s21 = scalar_lea.hbm %s1106_s26, 256  ;;  %s790_s25 = scalar_lea.hbm %s1158_s3, 512 }
 0x16d   : > { %p787_p0 = scmp.ne.s32.totalorder %s1106_s26, %s786_s21  ;;  %p791_p6 = scmp.lt.u32.totalorder %s1106_s26, %s1158_s3 }
 0x16e   : > { %p792_p7 = scmp.lt.u32.totalorder %s790_s25, %s786_s21  ;;  %p794_p8 = scmp.lt.u32.totalorder %s786_s21, %s1106_s26 }
 0x16f   : > { %p788_p4 = pnand %p787_p0, %p1173_p12 }
 0x170   : > { %p793_p2 = por %p792_p7, %p791_p6 }
 0x171   : > { %p789_p13 = pneg %p788_p4 }
 0x172   : > { %p795_p1 = por %p794_p8, %p793_p2 }
 0x174   : > { %p796_p10 = pnand %p795_p1, %p789_p13 }
 0x176   : > { %799 = shalt.err (!%p796_p10)
}
 0x177   : > { %s869_s20 = smov 128   ;;  %s870_s24 = smov 8  }
 0x178   : > { %594 = dma.vmem_to_hbm [thread:$0]  (%p1173_p12), %s1101_s22, 256, %s1106_s26, %s420_s9, %s869_s20, %s869_s20, %s870_s24  }
 0x179 PF: > { %s449_s7 = sand.u32 1, %s838_s12   ;;  %p1174_p3 = scmp.ne.s32.totalorder %s1166_s23, 0 }
 0x17a   : > { %p1175_p5 = scmp.ge.s32.totalorder %s858_s17, 2  ;;  %s450_s8 = scalar_lea.sflag [#allocation5], %s449_s7 }
 0x17c   : > { %p608_p9 = pnand %p1175_p5, %p1174_p3 }
 0x17e   : > { %833 = dma.done.wait (!%p608_p9), %s450_s8, 256  }
 0x17f   : > { %835 = vsyncadd (!%p608_p9), %s450_s8, 4294967040  ;;  %s20_s17 = sadd.s32 1, %s858_s17   ;;  %s1176_s12 = smov %s842_s13 }
 0x180   : > { %p17_p11 = scmp.ge.s32.totalorder %s20_s17, 4   ;;  %s1177_s13 = smov %s846_s14 }
 0x181   : > { %s1178_s14 = smov %s1034_s4  ;;  %s1179_s15 = smov %s854_s16 }
 0x182   : > { %s1180_s16 = smov %s1182_s18  ;;  %19 = sbr.rel (!%p17_p11) target bundleno = 7 (0x7), region = 95 }
 0x189   :  { %455 = vsyncpa [#allocation4], 1 }
 0x18a   :  { %457 = vsyncpa [#allocation4 + $0x1], 1 }
 0x18b   :  { %458 = vsyncpa [#allocation7], 1 }
 0x18c   :  { %459 = vsyncpa [#allocation5], 1 }
 0x18d   :  { %461 = vsyncpa [#allocation5 + $0x1], 1 }

</bundles_post_ra>
